<compile_context>
chip_gen: v5e
topology: v5e:2x2
jax: 0.10.0
libtpu: 0.0.40
codegen_flags: <defaults>
</compile_context>

<pallas_src>
import jax
import jax.numpy as jnp
from jax import lax
from jax.experimental import pallas as pl
from jax.experimental.pallas import tpu as pltpu


def _discriminator_kernel(x_ref, w1_ref, b1_ref, w2_ref, b2_ref, o_ref):
    # x_ref : [tm, K]   VMEM  (one batch tile, double-buffered by BlockSpec)
    # w1_ref: [K, nh]   VMEM  (resident across the grid)
    # b1_ref: [1, nh]   VMEM  (resident)
    # w2_ref: [1, nh]   VMEM  (output-layer weights as a row, resident)
    # b2_ref: [1, 1]    SMEM  (scalar)
    # o_ref : [1, tm]   VMEM  (batch on the lane axis -> lane-dense store)

    # Hidden layer on the MXU, f32 accumulation (x may be f32 or bf16).
    h = jnp.dot(x_ref[...], w1_ref[...], preferred_element_type=jnp.float32)
    h = h + b1_ref[...].astype(jnp.float32)

    # leaky_relu, negative slope 0.01 (f32 on the VPU).
    h = jnp.where(h > 0, h, 0.01 * h)

    # Output layer: contract the last axes of [1, nh] x [tm, nh] -> [1, tm].
    # No materialized h.T; batch ends up on lanes for the store below.
    z = lax.dot_general(w2_ref[...], h, (((1,), (1,)), ((), ())),
                        preferred_element_type=jnp.float32)
    z = z + b2_ref[0, 0]

    # Exact sigmoid: exp on the EUP, exact divide (kernel is DMA-bound; exact is free).
    o_ref[...] = (1.0 / (1.0 + jnp.exp(-z))).astype(o_ref.dtype)


def discriminator_forward(x, w1, b1, w2, b2, *, block_m=512):
    """x: [bs, in_dim], w1: [in_dim, nh], b1: [nh], w2: [nh, 1], b2: [1] -> [bs] probs.

    For best HBM throughput, pass bf16 x together with bf16 w1/b1 when the upstream
    producer already has bf16 (do not cast f32 -> bf16 here; that adds an HBM pass).
    On v7x, sweeping block_m up to 1024-2048 is still VMEM-safe; cap ~1024 on v5e.
    """
    bs, in_dim = x.shape
    n_hidden = w1.shape[1]

    # Batch tiling without any padding of x:
    #   * bs <= block_m: one block covering the whole batch (block == full array dims,
    #     so the (8,128) rule is trivially satisfied; no partial block at all).
    #   * bs  > block_m: block_m (multiple of 128) tiles; the last tile is ragged.
    #     OOB x rows are undefined garbage and the matching output lanes are dropped
    #     on store — safe only because every op here is row-independent.
    if bs <= block_m:
        block_m = bs
    else:
        assert block_m % 128 == 0, "block_m must be a multiple of 128"
    n_tiles = pl.cdiv(bs, block_m)

    b1_row = b1.reshape(1, n_hidden)
    w2_row = w2.reshape(1, n_hidden)                 # [nh, 1] -> [1, nh]
    b2_s = b2.reshape(1, 1).astype(jnp.float32)      # SMEM scalar

    x_bytes = bs * in_dim * jnp.dtype(x.dtype).itemsize
    w_bytes = (in_dim * n_hidden) * jnp.dtype(w1.dtype).itemsize + (2 * n_hidden + 2) * 4
    cost = pl.CostEstimate(
        flops=2 * bs * n_hidden * (in_dim + 1),
        transcendentals=bs,
        bytes_accessed=x_bytes + w_bytes + bs * 4,
    )

    out = pl.pallas_call(
        _discriminator_kernel,
        out_shape=jax.ShapeDtypeStruct((1, bs), jnp.float32),
        grid=(n_tiles,),
        in_specs=[
            pl.BlockSpec((block_m, in_dim), lambda i: (i, 0)),   # x batch tile
            pl.BlockSpec((in_dim, n_hidden), lambda i: (0, 0)),  # W1 (resident)
            pl.BlockSpec((1, n_hidden), lambda i: (0, 0)),       # b1 (resident)
            pl.BlockSpec((1, n_hidden), lambda i: (0, 0)),       # W2 row (resident)
            pl.BlockSpec(memory_space=pltpu.MemorySpace.SMEM),   # b2 scalar
        ],
        out_specs=pl.BlockSpec((1, block_m), lambda i: (0, i)),  # lane-dense output row
        compiler_params=pltpu.CompilerParams(
            dimension_semantics=("parallel",)),
        cost_estimate=cost,
    )(x, w1, b1_row, w2_row, b2_s)

    return out.reshape(-1)


def init_params(key, in_dim, n_hidden):
    """Deterministic init mimicking nn.Linear default U[-1/sqrt(fan_in), +1/sqrt(fan_in)]."""
    k1, k2, k3, k4 = jax.random.split(key, 4)
    bound1 = 1.0 / (in_dim ** 0.5)
    bound2 = 1.0 / (n_hidden ** 0.5)
    w1 = jax.random.uniform(k1, (in_dim, n_hidden), jnp.float32, -bound1, bound1)
    b1 = jax.random.uniform(k2, (n_hidden,), jnp.float32, -bound1, bound1)
    w2 = jax.random.uniform(k3, (n_hidden, 1), jnp.float32, -bound2, bound2)
    b2 = jax.random.uniform(k4, (1,), jnp.float32, -bound2, bound2)
    return w1, b1, w2, b2


if __name__ == "__main__":
    key = jax.random.PRNGKey(0)
    k_x, k_p = jax.random.split(key)

    # Shapes consistent with the module: in_dim=784 (28*28), n_hidden=32.
    # bs=200 exercises both the single-full-block path and the ragged multi-tile path.
    bs, in_dim, n_hidden = 200, 784, 32

    x = jax.random.normal(k_x, (bs, in_dim), jnp.float32)
    w1, b1, w2, b2 = init_params(k_p, in_dim, n_hidden)

    # Reference in plain JAX.
    h_ref = x @ w1 + b1
    h_ref = jnp.where(h_ref > 0, h_ref, 0.01 * h_ref)
    ref = jax.nn.sigmoid(h_ref @ w2 + b2).reshape(-1)

    # 1) Default block_m (clamped to bs -> single full-array block, no padding anywhere).
    out = discriminator_forward(x, w1, b1, w2, b2)
    jax.block_until_ready(out)
    assert out.shape == (bs,)
    err = float(jnp.max(jnp.abs(out - ref)))
    assert err < 1e-4, f"f32 single-tile max abs err {err}"

    # 2) Multi-tile path with a ragged last tile (block_m=128 -> grid of 2, 72-row tail).
    out2 = discriminator_forward(x, w1, b1, w2, b2, block_m=128)
    jax.block_until_ready(out2)
    err2 = float(jnp.max(jnp.abs(out2 - ref)))
    assert err2 < 1e-4, f"f32 ragged-tile max abs err {err2}"

    # 3) bf16 activation stream from "upstream" (weights cast by caller; f32 accumulation).
    out_bf = discriminator_forward(
        x.astype(jnp.bfloat16),
        w1.astype(jnp.bfloat16),
        b1.astype(jnp.bfloat16),
        w2, b2, block_m=128)
    jax.block_until_ready(out_bf)
    err3 = float(jnp.max(jnp.abs(out_bf - ref)))
    assert err3 < 5e-2, f"bf16 max abs err {err3}"

    print("KERNEL_OK")
</pallas_src>

<mosaic_0001>
module attributes {stable_mosaic.version = 11 : i64} {
  func.func @_discriminator_kernel(%arg0: i32, %arg1: memref<200x784xf32, #tpu.memory_space<vmem>>, %arg2: memref<784x32xf32, #tpu.memory_space<vmem>>, %arg3: memref<1x32xf32, #tpu.memory_space<vmem>>, %arg4: memref<1x32xf32, #tpu.memory_space<vmem>>, %arg5: memref<1x1xf32, #tpu.memory_space<smem>>, %arg6: memref<1x200xf32, #tpu.memory_space<vmem>>) attributes {dimension_semantics = [#tpu.dimension_semantics<parallel>], iteration_bounds = array<i64: 1>, scalar_prefetch = 0 : i64, scratch_operands = 0 : i64, tpu.core_type = #tpu.core_type<tc>, window_params = [{transform_indices = @transform_0, window_bounds = array<i64: 200, 784>}, {pipeline_mode = #tpu.pipeline_mode<synchronous>, transform_indices = @transform_1, window_bounds = array<i64: 784, 32>}, {pipeline_mode = #tpu.pipeline_mode<synchronous>, transform_indices = @transform_2, window_bounds = array<i64: 1, 32>}, {pipeline_mode = #tpu.pipeline_mode<synchronous>, transform_indices = @transform_3, window_bounds = array<i64: 1, 32>}, {transform_indices = @transform_4, window_bounds = array<i64: 1, 1>}, {transform_indices = @transform_5, window_bounds = array<i64: 1, 200>}]} {
    %c0 = arith.constant 0 : index
    %c0_0 = arith.constant 0 : index
    %0 = vector.load %arg1[%c0, %c0_0] : memref<200x784xf32, #tpu.memory_space<vmem>>, vector<200x784xf32>
    %c0_1 = arith.constant 0 : index
    %c0_2 = arith.constant 0 : index
    %1 = vector.load %arg2[%c0_1, %c0_2] : memref<784x32xf32, #tpu.memory_space<vmem>>, vector<784x32xf32>
    %cst = arith.constant dense<0.000000e+00> : vector<200x32xf32>
    %2 = tpu.matmul %0, %1, %cst {dimension_numbers = #tpu.dot_dimension_numbers<[1], [0], [0], [1], [0, 0, 1, 1], [], []>} : vector<200x784xf32>, vector<784x32xf32>, vector<200x32xf32> -> vector<200x32xf32>
    %c0_3 = arith.constant 0 : index
    %c0_4 = arith.constant 0 : index
    %3 = vector.load %arg3[%c0_3, %c0_4] : memref<1x32xf32, #tpu.memory_space<vmem>>, vector<1x32xf32>
    %4 = vector.broadcast %3 : vector<1x32xf32> to vector<200x32xf32>
    %5 = arith.addf %2, %4 : vector<200x32xf32>
    %cst_5 = arith.constant 0.000000e+00 : f32
    %6 = vector.broadcast %cst_5 : f32 to vector<200x32xf32>
    %7 = arith.cmpf ogt, %5, %6 : vector<200x32xf32>
    %cst_6 = arith.constant 0.00999999977 : f32
    %8 = vector.broadcast %cst_6 : f32 to vector<200x32xf32>
    %9 = arith.mulf %8, %5 : vector<200x32xf32>
    %10 = arith.select %7, %5, %9 : vector<200x32xi1>, vector<200x32xf32>
    %c0_7 = arith.constant 0 : index
    %c0_8 = arith.constant 0 : index
    %11 = vector.load %arg4[%c0_7, %c0_8] : memref<1x32xf32, #tpu.memory_space<vmem>>, vector<1x32xf32>
    %cst_9 = arith.constant dense<0.000000e+00> : vector<1x200xf32>
    %12 = tpu.matmul %11, %10, %cst_9 {dimension_numbers = #tpu.dot_dimension_numbers<[1], [1], [0], [0], [0, 0, 1, 0], [], []>} : vector<1x32xf32>, vector<200x32xf32>, vector<1x200xf32> -> vector<1x200xf32>
    %c0_10 = arith.constant 0 : index
    %c0_11 = arith.constant 0 : index
    %13 = memref.load %arg5[%c0_10, %c0_11] : memref<1x1xf32, #tpu.memory_space<smem>>
    %14 = vector.broadcast %13 : f32 to vector<1x200xf32>
    %15 = arith.addf %12, %14 : vector<1x200xf32>
    %cst_12 = arith.constant 0.000000e+00 : f32
    %16 = vector.broadcast %cst_12 : f32 to vector<1x200xf32>
    %17 = arith.subf %16, %15 : vector<1x200xf32>
    %18 = math.exp %17 : vector<1x200xf32>
    %cst_13 = arith.constant 1.000000e+00 : f32
    %19 = vector.broadcast %cst_13 : f32 to vector<1x200xf32>
    %20 = arith.addf %19, %18 : vector<1x200xf32>
    %cst_14 = arith.constant 1.000000e+00 : f32
    %21 = vector.broadcast %cst_14 : f32 to vector<1x200xf32>
    %22 = arith.divf %21, %20 : vector<1x200xf32>
    %c0_15 = arith.constant 0 : index
    %c0_16 = arith.constant 0 : index
    %23 = vector.load %arg6[%c0_15, %c0_16] : memref<1x200xf32, #tpu.memory_space<vmem>>, vector<1x200xf32>
    tpu.vector_store %arg6[%c0_15, %c0_16], %22 {strides = array<i32>} : memref<1x200xf32, #tpu.memory_space<vmem>>, vector<1x200xf32>,
    return
  }
  func.func @transform_0(%arg0: i32) -> (i32, i32) {
    %c0_i32 = arith.constant 0 : i32
    %c0_i32_0 = arith.constant 0 : i32
    return %arg0, %c0_i32 : i32, i32
  }
  func.func @transform_1(%arg0: i32) -> (i32, i32) {
    %c0_i32 = arith.constant 0 : i32
    %c0_i32_0 = arith.constant 0 : i32
    %c0_i32_1 = arith.constant 0 : i32
    return %c0_i32, %c0_i32_0 : i32, i32
  }
  func.func @transform_2(%arg0: i32) -> (i32, i32) {
    %c0_i32 = arith.constant 0 : i32
    %c0_i32_0 = arith.constant 0 : i32
    %c0_i32_1 = arith.constant 0 : i32
    return %c0_i32, %c0_i32_0 : i32, i32
  }
  func.func @transform_3(%arg0: i32) -> (i32, i32) {
    %c0_i32 = arith.constant 0 : i32
    %c0_i32_0 = arith.constant 0 : i32
    %c0_i32_1 = arith.constant 0 : i32
    return %c0_i32, %c0_i32_0 : i32, i32
  }
  func.func @transform_4(%arg0: i32) -> (i32, i32) {
    %c0_i32 = arith.constant 0 : i32
    %c0_i32_0 = arith.constant 0 : i32
    %c0_i32_1 = arith.constant 0 : i32
    return %c0_i32, %c0_i32_0 : i32, i32
  }
  func.func @transform_5(%arg0: i32) -> (i32, i32) {
    %c0_i32 = arith.constant 0 : i32
    %c0_i32_0 = arith.constant 0 : i32
    return %c0_i32, %arg0 : i32, i32
  }
}

</mosaic_0001>

<bundles_post_ra>
// kernel: tpu_custom_call.1
= control target key start
LH: loop header
LB: loop body
LE: loop exit
PB: predicated region body
PF: predicated region fallthrough
CT: control target
= control target key end

     0   :  { %11 = vsyncpa [#allocation4], 0  ;;  %s2391_s0 = inlined_call_operand.hbm [shape: f32[200,784], index: 0, kind: input, shape index: {}]   ;;  %s2392_s1 = inlined_call_operand.vmem [shape: f32[784,32], index: 1, kind: input, shape index: {}]   ;;  %s2393_s2 = inlined_call_operand.vmem [shape: f32[1,32], index: 2, kind: input, shape index: {}]   ;;  %s2394_s3 = inlined_call_operand.vmem [shape: f32[1,32], index: 3, kind: input, shape index: {}]   ;;  %s2395_s4 = inlined_call_operand.<no memory space> [shape: f32[1,1], index: 4, kind: input, shape index: {}]   ;;  %s2396_s5 = inlined_call_operand.hbm [shape: f32[1,200], index: 5, kind: output, shape index: {}]  }
   0x1   :  { %12 = vsyncpa [#allocation5], 0  ;;  %s17_s20 = sshll.u32 %s2391_s0, 4  ;;  %s1464_s21 = smov [#allocation3]   ;;  %s18_s20 = int_to_ptr.hbm [resolvable:$true] %s17_s20 }
   0x2   :  { %s19_s22 = sshll.u32 %s1464_s21, 4  ;;  %s1465_s23 = smov 896   ;;  %s20_s22 = int_to_ptr.vmem [resolvable:$true] %s19_s22 }
   0x3   :  { %s1466_s24 = smov 56  }
   0x4   :  { %25 = dma.hbm_to_vmem [thread:$0]  %s18_s20, 22400, %s20_s22, [#allocation4], %s1465_s23, %s1465_s23, %s1466_s24  }
   0x5   :  { %1460 = dma.done.wait [#allocation4], 22400  }
   0x6   :  { %1461 = vsyncadd [#allocation4], 4294944896  ;;  %v228_v0 = vld [vmem:[%s2392_s1 + $0x78] sm:$0xff]  ;;  %v227_v2 = vld [vmem:[%s2392_s1 + $0x70] sm:$0xff]  ;;  %vm315_vm0 = vcmask 130048   ;;  %vm1113_vm2 = vcmask 261120  }
   0x7   :  { %v1507_v1 = vld [vmem:[%s2392_s1 + $0x178] sm:$0xff]  ;;  %391 = vmatpush.msra.mxu0 %v228_v0  ;;  %1350 = vmatpush.msra.mxu3 %v228_v0  ;;  %v1520_v4 = vld [vmem:[%s2392_s1 + $0x170] sm:$0xff]  ;;  %v226_v5 = vld [vmem:[%s2392_s1 + $0x68] sm:$0xff]  ;;  %s1288_s21 = sshll.u32 %s2396_s5, 4  ;;  %s1289_s21 = int_to_ptr.hbm [resolvable:$true] %s1288_s21 }
   0x8   :  { %v1515_v3 = vld [vmem:[%s2392_s1 + $0xf8] sm:$0xff]  ;;  %575 = vmatpush.msra.mxu2 %v1507_v1  ;;  %v1530_v6 = vld [vmem:[%s2392_s1 + $0xf0] sm:$0xff]  ;;  %v1535_v7 = vld [vmem:[%s2392_s1 + $0x168] sm:$0xff] }
   0x9   :  { %483 = vmatpush.msra.mxu1 %v1515_v3  ;;  %392 = vmatpush.msra.mxu0 %v227_v2  ;;  %v1540_v8 = vld [vmem:[%s2392_s1 + $0xe8] sm:$0xff]  ;;  %v225_v9 = vld [vmem:[%s2392_s1 + $0x60] sm:$0xff]  ;;  %v224_v12 = vld [vmem:[%s2392_s1 + $0x58] sm:$0xff] }
   0xa   :  { %1351 = vmatpush.msra.mxu3 %v227_v2  ;;  %576 = vmatpush.msra.mxu2 %v1520_v4  ;;  %v1550_v10 = vld [vmem:[%s2392_s1 + $0x160] sm:$0xff]  ;;  %v1565_v13 = vld [vmem:[%s2392_s1 + $0x158] sm:$0xff]  ;;  %v223_v15 = vld [vmem:[%s2392_s1 + $0x50] sm:$0xff] }
   0xb   :  { %484 = vmatpush.msra.mxu1 %v1530_v6  ;;  %393 = vmatpush.msra.mxu0 %v226_v5  ;;  %v1555_v11 = vld [vmem:[%s2392_s1 + $0xe0] sm:$0xff]  ;;  %v1570_v14 = vld [vmem:[%s2392_s1 + $0xd8] sm:$0xff]  ;;  %v1580_v16 = vld [vmem:[%s2392_s1 + $0x150] sm:$0xff] }
   0xc   :  { %1352 = vmatpush.msra.mxu3 %v226_v5  ;;  %577 = vmatpush.msra.mxu2 %v1535_v7  ;;  %v1585_v17 = vld [vmem:[%s2392_s1 + $0xd0] sm:$0xff]  ;;  %v222_v18 = vld [vmem:[%s2392_s1 + $0x48] sm:$0xff]  ;;  %v221_v21 = vld [vmem:[%s2392_s1 + $0x40] sm:$0xff] }
   0xd   :  { %485 = vmatpush.msra.mxu1 %v1540_v8  ;;  %394 = vmatpush.msra.mxu0 %v225_v9  ;;  %v1595_v19 = vld [vmem:[%s2392_s1 + $0x148] sm:$0xff]  ;;  %v1610_v22 = vld [vmem:[%s2392_s1 + $0x140] sm:$0xff]  ;;  %v220_v24 = vld [vmem:[%s2392_s1 + $0x38] sm:$0xff] }
   0xe   :  { %1353 = vmatpush.msra.mxu3 %v225_v9  ;;  %578 = vmatpush.msra.mxu2 %v1550_v10  ;;  %v1600_v20 = vld [vmem:[%s2392_s1 + $0xc8] sm:$0xff]  ;;  %v1615_v23 = vld [vmem:[%s2392_s1 + $0xc0] sm:$0xff]  ;;  %v1625_v25 = vld [vmem:[%s2392_s1 + $0x138] sm:$0xff] }
   0xf   :  { %486 = vmatpush.msra.mxu1 %v1555_v11  ;;  %395 = vmatpush.msra.mxu0 %v224_v12  ;;  %v1630_v26 = vld [vmem:[%s2392_s1 + $0xb8] sm:$0xff]  ;;  %v219_v27 = vld [vmem:[%s2392_s1 + $0x30] sm:$0xff]  ;;  %v218_v30 = vld [vmem:[%s2392_s1 + $0x28] sm:$0xff] }
  0x10   :  { %1354 = vmatpush.msra.mxu3 %v224_v12  ;;  %579 = vmatpush.msra.mxu2 %v1565_v13  ;;  %v1640_v28 = vld [vmem:[%s2392_s1 + $0x130] sm:$0xff]  ;;  %v1655_v31 = vld [vmem:[%s2392_s1 + $0x128] sm:$0xff]  ;;  %v217_v33 = vld [vmem:[%s2392_s1 + $0x20] sm:$0xff] }
  0x11   :  { %487 = vmatpush.msra.mxu1 %v1570_v14  ;;  %396 = vmatpush.msra.mxu0 %v223_v15  ;;  %v1645_v29 = vld [vmem:[%s2392_s1 + $0xb0] sm:$0xff]  ;;  %v1660_v32 = vld [vmem:[%s2392_s1 + $0xa8] sm:$0xff]  ;;  %v1670_v34 = vld [vmem:[%s2392_s1 + $0x120] sm:$0xff] }
  0x12   :  { %1355 = vmatpush.msra.mxu3 %v223_v15  ;;  %580 = vmatpush.msra.mxu2 %v1580_v16  ;;  %v1675_v35 = vld [vmem:[%s2392_s1 + $0xa0] sm:$0xff]  ;;  %v216_v36 = vld [vmem:[%s2392_s1 + $0x18] sm:$0xff]  ;;  %v215_v39 = vld [vmem:[%s2392_s1 + $0x10] sm:$0xff] }
  0x13   :  { %488 = vmatpush.msra.mxu1 %v1585_v17  ;;  %397 = vmatpush.msra.mxu0 %v222_v18  ;;  %v1685_v37 = vld [vmem:[%s2392_s1 + $0x118] sm:$0xff]  ;;  %v1700_v40 = vld [vmem:[%s2392_s1 + $0x110] sm:$0xff]  ;;  %v214_v42 = vld [vmem:[%s2392_s1 + $0x8] sm:$0xff] }
  0x14   :  { %1356 = vmatpush.msra.mxu3 %v222_v18  ;;  %581 = vmatpush.msra.mxu2 %v1595_v19  ;;  %v1690_v38 = vld [vmem:[%s2392_s1 + $0x98] sm:$0xff]  ;;  %v1705_v41 = vld [vmem:[%s2392_s1 + $0x90] sm:$0xff]  ;;  %v1715_v43 = vld [vmem:[%s2392_s1 + $0x108] sm:$0xff] }
  0x15   :  { %489 = vmatpush.msra.mxu1 %v1600_v20  ;;  %398 = vmatpush.msra.mxu0 %v221_v21  ;;  %v230_v44 = vld [vmem:[%s2392_s1 + $0x88] sm:$0xff]  ;;  %v213_v45 = vld [vmem:[%s2392_s1] sm:$0xff]  ;;  %v185_v48 = vld [vmem:[#allocation3 + $0x498] sm:$0xff] }
  0x16   :  { %1357 = vmatpush.msra.mxu3 %v221_v21  ;;  %582 = vmatpush.msra.mxu2 %v1610_v22  ;;  %v1728_v46 = vld [vmem:[%s2392_s1 + $0x100] sm:$0xff]  ;;  %v40_v49 = vld [vmem:[#allocation3 + $0x10] sm:$0xff]  ;;  %v39_v51 = vld [vmem:[#allocation3 + $0x8] sm:$0xff] }
  0x17   :  { %490 = vmatpush.msra.mxu1 %v1615_v23  ;;  %399 = vmatpush.msra.mxu0 %v220_v24  ;;  %v38_v47 = vld [vmem:[#allocation3] sm:$0xff]  ;;  %v45_v52 = vld [vmem:[#allocation3 + $0x38] sm:$0xff]  ;;  %v192_v53 = vld [vmem:[#allocation3 + $0x4d0] sm:$0xff] }
  0x18   :  { %1358 = vmatpush.msra.mxu3 %v220_v24  ;;  %583 = vmatpush.msra.mxu2 %v1625_v25  ;;  %v229_v50 = vld [vmem:[%s2392_s1 + $0x80] sm:$0xff]  ;;  %v47_v54 = vld [vmem:[#allocation3 + $0x48] sm:$0xff]  ;;  %v52_v56 = vld [vmem:[#allocation3 + $0x70] sm:$0xff] }
  0x19   :  { %491 = vmatpush.msra.mxu1 %v1630_v26  ;;  %400 = vmatpush.msra.mxu0 %v219_v27  ;;  %v46_v55 = vld [vmem:[#allocation3 + $0x40] sm:$0xff]  ;;  %v199_v57 = vld [vmem:[#allocation3 + $0x508] sm:$0xff]  ;;  %v53_v59 = vld [vmem:[#allocation3 + $0x78] sm:$0xff] }
  0x1a   :  { %1359 = vmatpush.msra.mxu3 %v219_v27  ;;  %584 = vmatpush.msra.mxu2 %v1640_v28  ;;  %v54_v58 = vld [vmem:[#allocation3 + $0x80] sm:$0xff]  ;;  %v59_v60 = vld [vmem:[#allocation3 + $0xa8] sm:$0xff]  ;;  %v61_v62 = vld [vmem:[#allocation3 + $0xb8] sm:$0xff] }
  0x1b   :  { %492 = vmatpush.msra.mxu1 %v1645_v29  ;;  %401 = vmatpush.msra.mxu0 %v218_v30  ;;  %v206_v61 = vld [vmem:[#allocation3 + $0x540] sm:$0xff]  ;;  %v60_v63 = vld [vmem:[#allocation3 + $0xb0] sm:$0xff]  ;;  %v67_v5 = vld [vmem:[#allocation3 + $0xe8] sm:$0xff] }
  0x1c   :  { %1360 = vmatpush.msra.mxu3 %v218_v30  ;;  %585 = vmatpush.msra.mxu2 %v1655_v31  ;;  %v66_v0 = vld [vmem:[#allocation3 + $0xe0] sm:$0xff]  ;;  %v75_v9 = vld [vmem:[#allocation3 + $0x128] sm:$0xff]  ;;  %v88_v15 = vld [vmem:[#allocation3 + $0x190] sm:$0xff] }
  0x1d   :  { %493 = vmatpush.msra.mxu1 %v1660_v32  ;;  %402 = vmatpush.msra.mxu0 %v217_v33  ;;  %v186_v2 = vld [vmem:[#allocation3 + $0x4a0] sm:$0xff]  ;;  %v187_v18 = vld [vmem:[#allocation3 + $0x4a8] sm:$0xff]  ;;  %v275_v21 = vld [vmem:[%s2392_s1 + $0x1f0] sm:$0xff] }
  0x1e   :  { %1361 = vmatpush.msra.mxu3 %v217_v33  ;;  %586 = vmatpush.msra.mxu2 %v1670_v34  ;;  %v82_v12 = vld [vmem:[#allocation3 + $0x160] sm:$0xff]  ;;  %v292_v24 = vld [vmem:[%s2392_s1 + $0x278] sm:$0xff]  ;;  %v103_v27 = vld [vmem:[#allocation3 + $0x208] sm:$0xff] }
  0x1f   :  { %494 = vmatpush.msra.mxu1 %v1675_v35  ;;  %403 = vmatpush.msra.mxu0 %v216_v36  ;;  %v102_v30 = vld [vmem:[#allocation3 + $0x200] sm:$0xff]  ;;  %v270_v33 = vld [vmem:[%s2392_s1 + $0x1c8] sm:$0xff] }
  0x20   :  { %1362 = vmatpush.msra.mxu3 %v216_v36  ;;  %587 = vmatpush.msra.mxu2 %v1685_v37  ;;  %v110_v36 = vld [vmem:[#allocation3 + $0x240] sm:$0xff] }
  0x21   :  { %495 = vmatpush.msra.mxu1 %v1690_v38  ;;  %404 = vmatpush.msra.mxu0 %v215_v39 }
  0x22   :  { %1363 = vmatpush.msra.mxu3 %v215_v39  ;;  %588 = vmatpush.msra.mxu2 %v1700_v40  ;;  %v109_v39 = vld [vmem:[#allocation3 + $0x238] sm:$0xff] }
  0x23   :  { %496 = vmatpush.msra.mxu1 %v1705_v41  ;;  %405 = vmatpush.msra.mxu0 %v214_v42 }
  0x24   :  { %1364 = vmatpush.msra.mxu3 %v214_v42  ;;  %589 = vmatpush.msra.mxu2 %v1715_v43  ;;  %v291_v42 = vld [vmem:[%s2392_s1 + $0x270] sm:$0xff] }
  0x25   :  { %497 = vmatpush.msra.mxu1 %v230_v44  ;;  %406 = vmatpush.msra.mxu0 %v213_v45 }
  0x26   :  { %1365 = vmatpush.msra.mxu3 %v213_v45  ;;  %590 = vmatpush.msra.mxu2 %v1728_v46  ;;  %v115_v45 = vld [vmem:[#allocation3 + $0x268] sm:$0xff] }
  0x27   :  { %407 = vmatmul.f32.vlgmr.msra.gmra.mxu0 %v38_v47  ;;  %470 = vmatmul.f32.vlgmr.msra.gmra.mxu3 %v185_v48  ;;  %v208_v47 = vld [vmem:[#allocation3 + $0x550] sm:$0xff]  ;;  %v264_v48 = vld [vmem:[%s2392_s1 + $0x198] sm:$0xff] }
  0x28   :  { %591 = vmatmul.f32.vlgmr.msra.gmra.mxu2 %v40_v49  ;;  %1366 = vmatpush.msrb.mxu3 %v1515_v3  ;;  %v68_v3 = vld [vmem:[#allocation3 + $0xf0] sm:$0xff] }
  0x29   :  { %498 = vmatpush.msra.mxu1 %v229_v50  ;;  %759 = vmatpush.msrb.mxu0 %v292_v24  ;;  %v116_v49 = vld [vmem:[#allocation3 + $0x270] sm:$0xff]  ;;  %v69_v24 = vld [vmem:[#allocation3 + $0xf8] sm:$0xff] }
  0x2a   :  { %499 = vmatmul.f32.vlgmr.msra.gmra.mxu1 %v39_v51  ;;  %1367 = vmatpush.msrb.mxu3 %v1530_v6  ;;  %v73_v6 = vld [vmem:[#allocation3 + $0x118] sm:$0xff]  ;;  %v262_v51 = vld [vmem:[%s2392_s1 + $0x188] sm:$0xff] }
  0x2b   :  { %760 = vmatpush.msrb.mxu0 %v291_v42  ;;  %v309_v42 = vld [vmem:[%s2392_s1 + $0x300] sm:$0xff] }
  0x2c   :  { %1368 = vmatpush.msrb.mxu3 %v1540_v8  ;;  %v193_v8 = vld [vmem:[#allocation3 + $0x4d8] sm:$0xff] }
  0x2e   :  { %1369 = vmatpush.msrb.mxu3 %v1555_v11  ;;  %v74_v11 = vld [vmem:[#allocation3 + $0x120] sm:$0xff] }
  0x2f   :  { %410 = vmatmul.f32.gmra.mxu0 %v45_v52  ;;  %473 = vmatmul.f32.gmra.mxu3 %v192_v53  ;;  %v290_v52 = vld [vmem:[%s2392_s1 + $0x268] sm:$0xff]  ;;  %v261_v53 = vld [vmem:[%s2392_s1 + $0x180] sm:$0xff] }
  0x30   :  { %594 = vmatmul.f32.gmra.mxu2 %v47_v54  ;;  %1370 = vmatpush.msrb.mxu3 %v1570_v14  ;;  %v89_v14 = vld [vmem:[#allocation3 + $0x198] sm:$0xff]  ;;  %v122_v54 = vld [vmem:[#allocation3 + $0x2a0] sm:$0xff] }
  0x31   :  { %761 = vmatpush.msrb.mxu0 %v290_v52  ;;  %v166_v52 = vld [vmem:[#allocation3 + $0x400] sm:$0xff] }
  0x32   :  { %502 = vmatmul.f32.gmra.mxu1 %v46_v55  ;;  %1371 = vmatpush.msrb.mxu3 %v1585_v17  ;;  %v96_v17 = vld [vmem:[#allocation3 + $0x1d0] sm:$0xff] }
  0x33   :  { %v124_v55 = vld [vmem:[#allocation3 + $0x2b0] sm:$0xff] }
  0x34   :  { %1372 = vmatpush.msrb.mxu3 %v1600_v20  ;;  %v95_v20 = vld [vmem:[#allocation3 + $0x1c8] sm:$0xff] }
  0x36   :  { %1373 = vmatpush.msrb.mxu3 %v1615_v23  ;;  %v310_v23 = vld [vmem:[%s2392_s1 + $0x308] sm:$0xff] }
  0x37   :  { %413 = vmatmul.f32.gmra.mxu0 %v52_v56  ;;  %476 = vmatmul.f32.gmra.mxu3 %v199_v57  ;;  %v41_v56 = vld [vmem:[#allocation3 + $0x18] sm:$0xff]  ;;  %v306_v57 = vld [vmem:[%s2392_s1 + $0x2e8] sm:$0xff] }
  0x38   :  { %597 = vmatmul.f32.gmra.mxu2 %v54_v58  ;;  %1374 = vmatpush.msrb.mxu3 %v1630_v26  ;;  %v101_v26 = vld [vmem:[#allocation3 + $0x1f8] sm:$0xff]  ;;  %v123_v58 = vld [vmem:[#allocation3 + $0x2a8] sm:$0xff] }
  0x39   :  { %957 = vmatpush.msrb.mxu2 %v310_v23  ;;  %v152_v23 = vld [vmem:[#allocation3 + $0x390] sm:$0xff] }
  0x3a   :  { %505 = vmatmul.f32.gmra.mxu1 %v53_v59  ;;  %1375 = vmatpush.msrb.mxu3 %v1645_v29  ;;  %v272_v29 = vld [vmem:[%s2392_s1 + $0x1d8] sm:$0xff] }
  0x3b   :  { %v129_v59 = vld [vmem:[#allocation3 + $0x2d8] sm:$0xff]  ;;  %958 = vmatpush.msrb.mxu2 %v309_v42 }
  0x3c   :  { %1376 = vmatpush.msrb.mxu3 %v1660_v32  ;;  %v308_v32 = vld [vmem:[%s2392_s1 + $0x2f8] sm:$0xff] }
  0x3d   :  { %851 = vmatpush.msrb.mxu1 %v308_v32  ;;  %v296_v32 = vld [vmem:[%s2392_s1 + $0x298] sm:$0xff] }
  0x3e   :  { %1377 = vmatpush.msrb.mxu3 %v1675_v35  ;;  %v108_v35 = vld [vmem:[#allocation3 + $0x230] sm:$0xff]  ;;  %v57_v42 = vld [vmem:[#allocation3 + $0x98] sm:$0xff] }
  0x3f   :  { %416 = vmatmul.f32.gmra.mxu0 %v59_v60  ;;  %479 = vmatmul.f32.gmra.mxu3 %v206_v61  ;;  %v131_v60 = vld [vmem:[#allocation3 + $0x2e8] sm:$0xff]  ;;  %v48_v61 = vld [vmem:[#allocation3 + $0x50] sm:$0xff] }
  0x40   :  { %600 = vmatmul.f32.gmra.mxu2 %v61_v62  ;;  %1378 = vmatpush.msrb.mxu3 %v1690_v38  ;;  %v268_v38 = vld [vmem:[%s2392_s1 + $0x1b8] sm:$0xff]  ;;  %v130_v62 = vld [vmem:[#allocation3 + $0x2e0] sm:$0xff] }
  0x42   :  { %508 = vmatmul.f32.gmra.mxu1 %v60_v63  ;;  %1379 = vmatpush.msrb.mxu3 %v1705_v41  ;;  %v266_v41 = vld [vmem:[%s2392_s1 + $0x1a8] sm:$0xff]  ;;  %v289_v63 = vld [vmem:[%s2392_s1 + $0x260] sm:$0xff] }
  0x43   :  { %762 = vmatpush.msrb.mxu0 %v289_v63  ;;  %v172_v63 = vld [vmem:[#allocation3 + $0x430] sm:$0xff] }
  0x44   :  { %1380 = vmatpush.msrb.mxu3 %v230_v44  ;;  %v265_v44 = vld [vmem:[%s2392_s1 + $0x1a0] sm:$0xff] }
  0x46   :  { %1381 = vmatpush.msrb.mxu3 %v229_v50  ;;  %v263_v50 = vld [vmem:[%s2392_s1 + $0x190] sm:$0xff] }
  0x47   :  { %419 = vmatmul.f32.gmra.mxu0 %v66_v0  ;;  %562 = vmatmul.f32.vlgmr.msrb.gmra.mxu3 %v186_v2  ;;  %v305_v0 = vld [vmem:[%s2392_s1 + $0x2e0] sm:$0xff]  ;;  %v136_v2 = vld [vmem:[#allocation3 + $0x310] sm:$0xff] }
  0x48   :  { %603 = vmatmul.f32.gmra.mxu2 %v68_v3  ;;  %1382 = vmatpush.msra.mxu3 %v1507_v1  ;;  %v80_v1 = vld [vmem:[#allocation3 + $0x150] sm:$0xff]  ;;  %v138_v3 = vld [vmem:[#allocation3 + $0x320] sm:$0xff] }
  0x4a   :  { %511 = vmatmul.f32.gmra.mxu1 %v67_v5  ;;  %1383 = vmatpush.msra.mxu3 %v1520_v4  ;;  %v200_v4 = vld [vmem:[#allocation3 + $0x510] sm:$0xff]  ;;  %v55_v5 = vld [vmem:[#allocation3 + $0x88] sm:$0xff] }
  0x4c   :  { %1384 = vmatpush.msra.mxu3 %v1535_v7  ;;  %v81_v7 = vld [vmem:[#allocation3 + $0x158] sm:$0xff] }
  0x4e   :  { %1385 = vmatpush.msra.mxu3 %v1550_v10  ;;  %v87_v10 = vld [vmem:[#allocation3 + $0x188] sm:$0xff] }
  0x4f   :  { %422 = vmatmul.f32.gmra.mxu0 %v73_v6  ;;  %565 = vmatmul.f32.gmra.mxu3 %v193_v8  ;;  %v137_v6 = vld [vmem:[#allocation3 + $0x318] sm:$0xff] }
  0x50   :  { %606 = vmatmul.f32.gmra.mxu2 %v75_v9  ;;  %1386 = vmatpush.msra.mxu3 %v1565_v13  ;;  %v207_v13 = vld [vmem:[#allocation3 + $0x548] sm:$0xff]  ;;  %v288_v8 = vld [vmem:[%s2392_s1 + $0x258] sm:$0xff]  ;;  %v287_v9 = vld [vmem:[%s2392_s1 + $0x250] sm:$0xff] }
  0x51   :  { %763 = vmatpush.msrb.mxu0 %v288_v8  ;;  %v97_v8 = vld [vmem:[#allocation3 + $0x1d8] sm:$0xff] }
  0x52   :  { %514 = vmatmul.f32.gmra.mxu1 %v74_v11  ;;  %1387 = vmatpush.msra.mxu3 %v1580_v16  ;;  %v94_v16 = vld [vmem:[#allocation3 + $0x1c0] sm:$0xff]  ;;  %v304_v11 = vld [vmem:[%s2392_s1 + $0x2d8] sm:$0xff] }
  0x53   :  { %764 = vmatpush.msrb.mxu0 %v287_v9  ;;  %v1946_v9 = vld [vmem:[%s2393_s2] ss:$0 sm:$0xff] }
  0x54   :  { %1388 = vmatpush.msra.mxu3 %v1595_v19  ;;  %v276_v19 = vld [vmem:[%s2392_s1 + $0x1f8] sm:$0xff] }
  0x56   :  { %1389 = vmatpush.msra.mxu3 %v1610_v22  ;;  %v274_v22 = vld [vmem:[%s2392_s1 + $0x1e8] sm:$0xff] }
  0x57   :  { %425 = vmatmul.f32.gmra.mxu0 %v80_v1  ;;  %568 = vmatmul.f32.gmra.mxu3 %v200_v4  ;;  %v143_v1 = vld [vmem:[#allocation3 + $0x348] sm:$0xff] }
  0x58   :  { %609 = vmatmul.f32.gmra.mxu2 %v82_v12  ;;  %1390 = vmatpush.msra.mxu3 %v1625_v25  ;;  %v273_v25 = vld [vmem:[%s2392_s1 + $0x1e0] sm:$0xff]  ;;  %v286_v4 = vld [vmem:[%s2392_s1 + $0x248] sm:$0xff]  ;;  %v303_v12 = vld [vmem:[%s2392_s1 + $0x2d0] sm:$0xff] }
  0x59   :  { %765 = vmatpush.msrb.mxu0 %v286_v4 }
  0x5a   :  { %517 = vmatmul.f32.gmra.mxu1 %v81_v7  ;;  %1391 = vmatpush.msra.mxu3 %v1640_v28  ;;  %v194_v28 = vld [vmem:[#allocation3 + $0x4e0] sm:$0xff]  ;;  %v145_v7 = vld [vmem:[#allocation3 + $0x358] sm:$0xff] }
  0x5c   :  { %1392 = vmatpush.msra.mxu3 %v1655_v31  ;;  %v271_v31 = vld [vmem:[%s2392_s1 + $0x1d0] sm:$0xff] }
  0x5e   :  { %1393 = vmatpush.msra.mxu3 %v1670_v34  ;;  %v269_v34 = vld [vmem:[%s2392_s1 + $0x1c0] sm:$0xff] }
  0x5f   :  { %428 = vmatmul.f32.gmra.mxu0 %v87_v10  ;;  %571 = vmatmul.f32.gmra.mxu3 %v207_v13  ;;  %v62_v10 = vld [vmem:[#allocation3 + $0xc0] sm:$0xff] }
  0x60   :  { %612 = vmatmul.f32.gmra.mxu2 %v89_v14  ;;  %1394 = vmatpush.msra.mxu3 %v1685_v37  ;;  %v201_v37 = vld [vmem:[#allocation3 + $0x518] sm:$0xff]  ;;  %v285_v13 = vld [vmem:[%s2392_s1 + $0x240] sm:$0xff]  ;;  %v302_v14 = vld [vmem:[%s2392_s1 + $0x2c8] sm:$0xff] }
  0x61   :  { %766 = vmatpush.msrb.mxu0 %v285_v13 }
  0x62   :  { %520 = vmatmul.f32.gmra.mxu1 %v88_v15  ;;  %1395 = vmatpush.msra.mxu3 %v1700_v40  ;;  %v267_v40 = vld [vmem:[%s2392_s1 + $0x1b0] sm:$0xff] }
  0x63   :  { %v144_v15 = vld [vmem:[#allocation3 + $0x350] sm:$0xff] }
  0x64   :  { %1396 = vmatpush.msra.mxu3 %v1715_v43  ;;  %v307_v43 = vld [vmem:[%s2392_s1 + $0x2f0] sm:$0xff] }
  0x65   :  { %852 = vmatpush.msrb.mxu1 %v307_v43 }
  0x66   :  { %1397 = vmatpush.msra.mxu3 %v1728_v46  ;;  %v117_v46 = vld [vmem:[#allocation3 + $0x278] sm:$0xff] }
  0x67   :  { %431 = vmatmul.f32.gmra.mxu0 %v94_v16  ;;  %654 = vmatmul.f32.vlgmr.msra.gmra.mxu3 %v187_v18  ;;  %v284_v16 = vld [vmem:[%s2392_s1 + $0x238] sm:$0xff]  ;;  %v283_v18 = vld [vmem:[%s2392_s1 + $0x230] sm:$0xff] }
  0x68   :  { %615 = vmatmul.f32.gmra.mxu2 %v96_v17  ;;  %667 = vmatpush.msrb.mxu3 %v276_v19  ;;  %v301_v17 = vld [vmem:[%s2392_s1 + $0x2c0] sm:$0xff]  ;;  %v300_v19 = vld [vmem:[%s2392_s1 + $0x2b8] sm:$0xff] }
  0x69   :  { %853 = vmatpush.msrb.mxu1 %v306_v57  ;;  %767 = vmatpush.msrb.mxu0 %v284_v16  ;;  %v44_v16 = vld [vmem:[#allocation3 + $0x30] sm:$0xff] }
  0x6a   :  { %523 = vmatmul.f32.gmra.mxu1 %v95_v20  ;;  %668 = vmatpush.msrb.mxu3 %v275_v21  ;;  %v150_v21 = vld [vmem:[#allocation3 + $0x380] sm:$0xff] }
  0x6b   :  { %854 = vmatpush.msrb.mxu1 %v305_v0  ;;  %768 = vmatpush.msrb.mxu0 %v283_v18  ;;  %v43_v18 = vld [vmem:[#allocation3 + $0x28] sm:$0xff] }
  0x6c   :  { %669 = vmatpush.msrb.mxu3 %v274_v22  ;;  %v299_v22 = vld [vmem:[%s2392_s1 + $0x2b0] sm:$0xff] }
  0x6d   :  { %855 = vmatpush.msrb.mxu1 %v304_v11 }
  0x6e   :  { %670 = vmatpush.msrb.mxu3 %v273_v25  ;;  %v282_v25 = vld [vmem:[%s2392_s1 + $0x228] sm:$0xff] }
  0x6f   :  { %434 = vmatmul.f32.gmra.mxu0 %v101_v26  ;;  %657 = vmatmul.f32.gmra.mxu3 %v194_v28  ;;  %v298_v26 = vld [vmem:[%s2392_s1 + $0x2a8] sm:$0xff] }
  0x70   :  { %618 = vmatmul.f32.gmra.mxu2 %v103_v27  ;;  %671 = vmatpush.msrb.mxu3 %v272_v29  ;;  %v151_v28 = vld [vmem:[#allocation3 + $0x388] sm:$0xff]  ;;  %v281_v29 = vld [vmem:[%s2392_s1 + $0x220] sm:$0xff] }
  0x71   :  { %856 = vmatpush.msrb.mxu1 %v303_v12  ;;  %769 = vmatpush.msrb.mxu0 %v282_v25  ;;  %v49_v25 = vld [vmem:[#allocation3 + $0x58] sm:$0xff] }
  0x72   :  { %526 = vmatmul.f32.gmra.mxu1 %v102_v30  ;;  %672 = vmatpush.msrb.mxu3 %v271_v31  ;;  %v297_v30 = vld [vmem:[%s2392_s1 + $0x2a0] sm:$0xff]  ;;  %v280_v31 = vld [vmem:[%s2392_s1 + $0x218] sm:$0xff] }
  0x73   :  { %857 = vmatpush.msrb.mxu1 %v302_v14  ;;  %770 = vmatpush.msrb.mxu0 %v281_v29  ;;  %v42_v14 = vld [vmem:[#allocation3 + $0x20] sm:$0xff] }
  0x74   :  { %673 = vmatpush.msrb.mxu3 %v270_v33 }
  0x75   :  { %858 = vmatpush.msrb.mxu1 %v301_v17  ;;  %771 = vmatpush.msrb.mxu0 %v280_v31 }
  0x76   :  { %674 = vmatpush.msrb.mxu3 %v269_v34 }
  0x77   :  { %437 = vmatmul.f32.gmra.mxu0 %v108_v35  ;;  %660 = vmatmul.f32.gmra.mxu3 %v201_v37  ;;  %v295_v37 = vld [vmem:[%s2392_s1 + $0x290] sm:$0xff] }
  0x78   :  { %621 = vmatmul.f32.gmra.mxu2 %v110_v36  ;;  %675 = vmatpush.msrb.mxu3 %v268_v38  ;;  %v157_v36 = vld [vmem:[#allocation3 + $0x3b8] sm:$0xff]  ;;  %v159_v38 = vld [vmem:[#allocation3 + $0x3c8] sm:$0xff] }
  0x79   :  { %859 = vmatpush.msrb.mxu1 %v300_v19 }
  0x7a   :  { %529 = vmatmul.f32.gmra.mxu1 %v109_v39  ;;  %676 = vmatpush.msrb.mxu3 %v267_v40  ;;  %v76_v39 = vld [vmem:[#allocation3 + $0x130] sm:$0xff] }
  0x7b   :  { %860 = vmatpush.msrb.mxu1 %v299_v22  ;;  %v279_v40 = vld [vmem:[%s2392_s1 + $0x210] sm:$0xff] }
  0x7c   :  { %677 = vmatpush.msrb.mxu3 %v266_v41  ;;  %v294_v41 = vld [vmem:[%s2392_s1 + $0x288] sm:$0xff]  ;;  %772 = vmatpush.msrb.mxu0 %v279_v40  ;;  %v58_v40 = vld [vmem:[#allocation3 + $0xa0] sm:$0xff] }
  0x7d   :  { %861 = vmatpush.msrb.mxu1 %v298_v26  ;;  %v111_v26 = vld [vmem:[#allocation3 + $0x248] sm:$0xff] }
  0x7e   :  { %678 = vmatpush.msrb.mxu3 %v265_v44  ;;  %v158_v44 = vld [vmem:[#allocation3 + $0x3c0] sm:$0xff] }
  0x7f   :  { %440 = vmatmul.f32.gmra.mxu0 %v115_v45  ;;  %663 = vmatmul.f32.gmra.mxu3 %v208_v47  ;;  %v278_v45 = vld [vmem:[%s2392_s1 + $0x208] sm:$0xff]  ;;  %v277_v47 = vld [vmem:[%s2392_s1 + $0x200] sm:$0xff] }
  0x80   :  { %624 = vmatmul.f32.gmra.mxu2 %v117_v46  ;;  %679 = vmatpush.msrb.mxu3 %v264_v48  ;;  %v293_v46 = vld [vmem:[%s2392_s1 + $0x280] sm:$0xff] }
  0x81   :  { %862 = vmatpush.msrb.mxu1 %v297_v30  ;;  %773 = vmatpush.msrb.mxu0 %v278_v45  ;;  %v50_v30 = vld [vmem:[#allocation3 + $0x60] sm:$0xff] }
  0x82   :  { %532 = vmatmul.f32.gmra.mxu1 %v116_v49  ;;  %680 = vmatpush.msrb.mxu3 %v263_v50 }
  0x83   :  { %863 = vmatpush.msrb.mxu1 %v296_v32  ;;  %774 = vmatpush.msrb.mxu0 %v277_v47 }
  0x84   :  { %681 = vmatpush.msrb.mxu3 %v262_v51  ;;  %v164_v51 = vld [vmem:[#allocation3 + $0x3f0] sm:$0xff] }
  0x85   :  { %864 = vmatpush.msrb.mxu1 %v295_v37 }
  0x86   :  { %682 = vmatpush.msrb.mxu3 %v261_v53  ;;  %v83_v53 = vld [vmem:[#allocation3 + $0x168] sm:$0xff] }
  0x87   :  { %443 = vmatmul.f32.gmra.mxu0 %v122_v54  ;;  %683 = vmatmul.f32.vlgmr.msrb.gmra.mxu3 %v41_v56 }
  0x88   :  { %627 = vmatmul.f32.gmra.mxu2 %v124_v55  ;;  %865 = vmatpush.msrb.mxu1 %v294_v41  ;;  %v165_v55 = vld [vmem:[#allocation3 + $0x3f8] sm:$0xff] }
  0x8a   :  { %535 = vmatmul.f32.gmra.mxu1 %v123_v58 }
  0x8b   :  { %866 = vmatpush.msrb.mxu1 %v293_v46 }
  0x8f   :  { %446 = vmatmul.f32.gmra.mxu0 %v129_v59  ;;  %686 = vmatmul.f32.gmra.mxu3 %v48_v61  ;;  %v171_v59 = vld [vmem:[#allocation3 + $0x428] sm:$0xff]  ;;  %v90_v61 = vld [vmem:[#allocation3 + $0x1a0] sm:$0xff] }
  0x90   :  { %630 = vmatmul.f32.gmra.mxu2 %v131_v60  ;;  %v173_v60 = vld [vmem:[#allocation3 + $0x438] sm:$0xff] }
  0x92   :  { %538 = vmatmul.f32.gmra.mxu1 %v130_v62 }
  0x97   :  { %449 = vmatmul.f32.gmra.mxu0 %v136_v2  ;;  %689 = vmatmul.f32.gmra.mxu3 %v55_v5  ;;  %v178_v5 = vld [vmem:[#allocation3 + $0x460] sm:$0xff] }
  0x98   :  { %633 = vmatmul.f32.gmra.mxu2 %v138_v3 }
  0x9a   :  { %541 = vmatmul.f32.gmra.mxu1 %v137_v6  ;;  %v180_v6 = vld [vmem:[#allocation3 + $0x470] sm:$0xff] }
  0x9f   :  { %452 = vmatmul.f32.gmra.mxu0 %v143_v1  ;;  %692 = vmatmul.f32.gmra.mxu3 %v62_v10  ;;  %v179_v1 = vld [vmem:[#allocation3 + $0x468] sm:$0xff] }
  0xa0   :  { %636 = vmatmul.f32.gmra.mxu2 %v145_v7 }
  0xa2   :  { %544 = vmatmul.f32.gmra.mxu1 %v144_v15  ;;  %v104_v15 = vld [vmem:[#allocation3 + $0x210] sm:$0xff] }
  0xa4   :  { %v1873_v20 = vpop.f32.mrf.mxu0 }
  0xa7   :  { %v1884_v27 = vpop.f32.mrf.mxu1  ;;  %455 = vmatmul.f32.gmra.mxu0 %v150_v21  ;;  %695 = vmatmul.f32.gmra.mxu3 %v69_v24 }
  0xa8   :  { %639 = vmatmul.f32.gmra.mxu2 %v152_v23 }
  0xaa   :  { %547 = vmatmul.f32.gmra.mxu1 %v151_v28  ;;  %v1898_v33 = vpop.f32.mrf.mxu3  ;;  %v51_v28 = vld [vmem:[#allocation3 + $0x68] sm:$0xff] }
  0xab   :  { %v1900_v34 = vpop.f32.mrf.mxu2  ;;  %v472_v4 = vadd.f32 %v1946_v9, %v1898_v33 }
  0xac   :  { %v1902_v35 = vpop.f32.mrf.mxu0 }
  0xaf   :  { %v1916_v43 = vpop.f32.mrf.mxu1  ;;  %458 = vmatmul.f32.gmra.mxu0 %v157_v36  ;;  %698 = vmatmul.f32.gmra.mxu3 %v76_v39  ;;  %v118_v39 = vld [vmem:[#allocation3 + $0x280] sm:$0xff] }
  0xb0   :  { %642 = vmatmul.f32.gmra.mxu2 %v159_v38  ;;  %v56_v38 = vld [vmem:[#allocation3 + $0x90] sm:$0xff] }
  0xb2   :  { %550 = vmatmul.f32.gmra.mxu1 %v158_v44  ;;  %v474_v48 = vpop.f32.mrf.mxu3 }
  0xb3   :  { %v1927_v49 = vpop.f32.mrf.mxu2  ;;  %v475_v19 = vadd.f32 %v1946_v9, %v474_v48 }
  0xb4   :  { %v1929_v50 = vpop.f32.mrf.mxu0 }
  0xb7   :  { %v1931_v54 = vpop.f32.mrf.mxu1  ;;  %461 = vmatmul.f32.gmra.mxu0 %v164_v51  ;;  %701 = vmatmul.f32.gmra.mxu3 %v83_v53  ;;  %v63_v51 = vld [vmem:[#allocation3 + $0xc8] sm:$0xff]  ;;  %v65_v53 = vld [vmem:[#allocation3 + $0xd8] sm:$0xff] }
  0xb8   :  { %645 = vmatmul.f32.gmra.mxu2 %v166_v52  ;;  %v125_v52 = vld [vmem:[#allocation3 + $0x2b8] sm:$0xff] }
  0xba   :  { %553 = vmatmul.f32.gmra.mxu1 %v165_v55  ;;  %v477_v56 = vpop.f32.mrf.mxu3 }
  0xbb   :  { %v1933_v57 = vpop.f32.mrf.mxu2  ;;  %v478_v31 = vadd.f32 %v1946_v9, %v477_v56  ;;  %v64_v56 = vld [vmem:[#allocation3 + $0xd0] sm:$0xff] }
  0xbc   :  { %v1935_v58 = vpop.f32.mrf.mxu0 }
  0xbf   :  { %v1937_v62 = vpop.f32.mrf.mxu1  ;;  %464 = vmatmul.f32.gmra.mxu0 %v171_v59  ;;  %704 = vmatmul.f32.gmra.mxu3 %v90_v61 }
  0xc0   :  { %648 = vmatmul.f32.gmra.mxu2 %v173_v60 }
  0xc2   :  { %556 = vmatmul.f32.gmra.mxu1 %v172_v63  ;;  %v480_v0 = vpop.f32.mrf.mxu3 }
  0xc3   :  { %v1939_v2 = vpop.f32.mrf.mxu2  ;;  %v481_v44 = vadd.f32 %v1946_v9, %v480_v0  ;;  %v70_v0 = vld [vmem:[#allocation3 + $0x100] sm:$0xff] }
  0xc4   :  { %v1941_v3 = vpop.f32.mrf.mxu0 }
  0xc7   :  { %v1948_v11 = vpop.f32.mrf.mxu1  ;;  %467 = vmatmul.f32.gmra.mxu0 %v178_v5  ;;  %707 = vmatmul.f32.gmra.mxu3 %v97_v8  ;;  %v132_v5 = vld [vmem:[#allocation3 + $0x2f0] sm:$0xff] }
  0xc8   :  { %651 = vmatmul.f32.gmra.mxu2 %v180_v6  ;;  %v72_v6 = vld [vmem:[#allocation3 + $0x110] sm:$0xff] }
  0xca   :  { %559 = vmatmul.f32.gmra.mxu1 %v179_v1  ;;  %v563_v12 = vpop.f32.mrf.mxu3  ;;  %v71_v1 = vld [vmem:[#allocation3 + $0x108] sm:$0xff] }
  0xcb   :  { %v1952_v7 = vpop.f32.mrf.mxu2  ;;  %v564_v10 = vadd.f32 %v563_v12, %v472_v4 }
  0xcc   :  { %v1954_v13 = vpop.f32.mrf.mxu0 }
  0xcf   :  { %v1956_v17 = vpop.f32.mrf.mxu1  ;;  %775 = vmatmul.f32.vlgmr.msrb.gmra.mxu0 %v42_v14  ;;  %710 = vmatmul.f32.gmra.mxu3 %v104_v15  ;;  %v77_v15 = vld [vmem:[#allocation3 + $0x138] sm:$0xff] }
  0xd0   :  { %1298 = vmatmul.msk.f32.vlgmr.msrb.gmra.mxu2 %vm315_vm0, %v44_v16  ;;  %v139_v16 = vld [vmem:[#allocation3 + $0x328] sm:$0xff] }
  0xd2   :  { %867 = vmatmul.f32.vlgmr.msrb.gmra.mxu1 %v43_v18  ;;  %v566_v21 = vpop.f32.mrf.mxu3  ;;  %v79_v18 = vld [vmem:[#allocation3 + $0x148] sm:$0xff] }
  0xd3   :  { %v1960_v22 = vpop.f32.mrf.mxu2  ;;  %v567_v23 = vadd.f32 %v566_v21, %v475_v19  ;;  %v78_v21 = vld [vmem:[#allocation3 + $0x140] sm:$0xff] }
  0xd4   :  { %v1962_v24 = vpop.f32.mrf.mxu0 }
  0xd7   :  { %v1964_v29 = vpop.f32.mrf.mxu1  ;;  %778 = vmatmul.f32.gmra.mxu0 %v49_v25  ;;  %713 = vmatmul.f32.gmra.mxu3 %v111_v26 }
  0xd8   :  { %1299 = vmatmul.msk.f32.gmra.mxu2 %vm315_vm0, %v51_v28 }
  0xda   :  { %870 = vmatmul.f32.gmra.mxu1 %v50_v30  ;;  %v569_v32 = vpop.f32.mrf.mxu3  ;;  %v84_v30 = vld [vmem:[#allocation3 + $0x170] sm:$0xff] }
  0xdb   :  { %v1968_v33 = vpop.f32.mrf.mxu2  ;;  %v570_v36 = vadd.f32 %v569_v32, %v478_v31  ;;  %v146_v31 = vld [vmem:[#allocation3 + $0x360] sm:$0xff] }
  0xdc   :  { %v1970_v37 = vpop.f32.mrf.mxu0  ;;  %v86_v32 = vld [vmem:[#allocation3 + $0x180] sm:$0xff] }
  0xdf   :  { %v1972_v41 = vpop.f32.mrf.mxu1  ;;  %781 = vmatmul.f32.gmra.mxu0 %v56_v38  ;;  %716 = vmatmul.f32.gmra.mxu3 %v118_v39  ;;  %v85_v39 = vld [vmem:[#allocation3 + $0x178] sm:$0xff] }
  0xe0   :  { %1300 = vmatmul.msk.f32.gmra.mxu2 %vm315_vm0, %v58_v40  ;;  %v409_v40 = vadd.f32 %v1946_v9, %v1873_v20 }
  0xe2   :  { %873 = vmatmul.f32.gmra.mxu1 %v57_v42  ;;  %v572_v45 = vpop.f32.mrf.mxu3 }
  0xe3   :  { %v1976_v46 = vpop.f32.mrf.mxu2  ;;  %v573_v47 = vadd.f32 %v572_v45, %v481_v44 }
  0xe4   :  { %v1978_v48 = vpop.f32.mrf.mxu0 }
  0xe7   :  { %v1980_v55 = vpop.f32.mrf.mxu1  ;;  %784 = vmatmul.f32.gmra.mxu0 %v63_v51  ;;  %719 = vmatmul.f32.gmra.mxu3 %v125_v52  ;;  %v91_v51 = vld [vmem:[#allocation3 + $0x1a8] sm:$0xff]  ;;  %v153_v52 = vld [vmem:[#allocation3 + $0x398] sm:$0xff] }
  0xe8   :  { %1301 = vmatmul.msk.f32.gmra.mxu2 %vm315_vm0, %v65_v53  ;;  %v93_v53 = vld [vmem:[#allocation3 + $0x1b8] sm:$0xff] }
  0xea   :  { %876 = vmatmul.f32.gmra.mxu1 %v64_v56  ;;  %v655_v60 = vpop.f32.mrf.mxu3  ;;  %v501_v56 = vadd.f32 %v1884_v27, %v409_v40  ;;  %v100_v27 = vld [vmem:[#allocation3 + $0x1f0] sm:$0xff]  ;;  %v106_v40 = vld [vmem:[#allocation3 + $0x220] sm:$0xff] }
  0xeb   :  { %v1983_v59 = vpop.f32.mrf.mxu2  ;;  %v1985_v61 = vadd.f32 %v655_v60, %v564_v10 }
  0xec   :  { %v1987_v63 = vpop.f32.mrf.mxu0  ;;  %v593_v20 = vadd.f32 %v1900_v34, %v501_v56  ;;  %v112_v56 = vld [vmem:[#allocation3 + $0x250] sm:$0xff] }
  0xed   :  { %2397 = vst [vmem:[#allocation9_spill] sm:$0xff] %v1985_v61 }
  0xef   :  { %v1989_v8 = vpop.f32.mrf.mxu1  ;;  %787 = vmatmul.f32.gmra.mxu0 %v70_v0  ;;  %722 = vmatmul.f32.gmra.mxu3 %v132_v5  ;;  %v92_v0 = vld [vmem:[#allocation3 + $0x1b0] sm:$0xff] }
  0xf0   :  { %1302 = vmatmul.msk.f32.gmra.mxu2 %vm315_vm0, %v72_v6 }
  0xf2   :  { %879 = vmatmul.f32.gmra.mxu1 %v71_v1  ;;  %v658_v12 = vpop.f32.mrf.mxu3 }
  0xf3   :  { %v1992_v4 = vpop.f32.mrf.mxu2  ;;  %v1994_v14 = vadd.f32 %v658_v12, %v567_v23  ;;  %v98_v12 = vld [vmem:[#allocation3 + $0x1e0] sm:$0xff] }
  0xf4   :  { %v1996_v10 = vpop.f32.mrf.mxu0 }
  0xf5   :  { %2398 = vst [vmem:[#allocation10_spill] sm:$0xff] %v1994_v14 }
  0xf7   :  { %v1998_v19 = vpop.f32.mrf.mxu1  ;;  %790 = vmatmul.f32.gmra.mxu0 %v77_v15  ;;  %725 = vmatmul.f32.gmra.mxu3 %v139_v16  ;;  %v160_v15 = vld [vmem:[#allocation3 + $0x3d0] sm:$0xff] }
  0xf8   :  { %1303 = vmatmul.msk.f32.gmra.mxu2 %vm315_vm0, %v79_v18  ;;  %v99_v18 = vld [vmem:[#allocation3 + $0x1e8] sm:$0xff] }
  0xfa   :  { %882 = vmatmul.f32.gmra.mxu1 %v78_v21  ;;  %v661_v26 = vpop.f32.mrf.mxu3 }
  0xfb   :  { %v2001_v25 = vpop.f32.mrf.mxu2  ;;  %v2003_v28 = vadd.f32 %v661_v26, %v570_v36 }
  0xfc   :  { %v2005_v23 = vpop.f32.mrf.mxu0 }
  0xff   :  { %v2007_v38 = vpop.f32.mrf.mxu1  ;;  %793 = vmatmul.f32.gmra.mxu0 %v84_v30  ;;  %728 = vmatmul.f32.gmra.mxu3 %v146_v31  ;;  %v105_v30 = vld [vmem:[#allocation3 + $0x218] sm:$0xff]  ;;  %v167_v31 = vld [vmem:[#allocation3 + $0x408] sm:$0xff] }
 0x100   :  { %1304 = vmatmul.msk.f32.gmra.mxu2 %vm315_vm0, %v86_v32  ;;  %v107_v32 = vld [vmem:[#allocation3 + $0x228] sm:$0xff] }
 0x102   :  { %885 = vmatmul.f32.gmra.mxu1 %v85_v39  ;;  %v664_v36 = vpop.f32.mrf.mxu3 }
 0x103   :  { %v2012_v42 = vpop.f32.mrf.mxu2  ;;  %v2014_v44 = vadd.f32 %v664_v36, %v573_v47  ;;  %v418_v36 = vadd.f32 %v1946_v9, %v1935_v58 }
 0x104   :  { %v2016_v45 = vpop.f32.mrf.mxu0 }
 0x105   :  { %2399 = vst [vmem:[#allocation11_spill] sm:$0xff] %v2014_v44 }
 0x107   :  { %v2019_v60 = vpop.f32.mrf.mxu1  ;;  %796 = vmatmul.f32.gmra.mxu0 %v91_v51  ;;  %731 = vmatmul.f32.gmra.mxu3 %v153_v52 }
 0x108   :  { %1305 = vmatmul.msk.f32.gmra.mxu2 %vm315_vm0, %v93_v53 }
 0x10a   :  { %888 = vmatmul.f32.gmra.mxu1 %v92_v0  ;;  %v684_v47 = vpop.f32.mrf.mxu3  ;;  %v174_v0 = vld [vmem:[#allocation3 + $0x440] sm:$0xff] }
 0x10b   :  { %v2023_v5 = vpop.f32.mrf.mxu2  ;;  %v2025_v6 = vadd.f32 %v684_v47, %v593_v20  ;;  %v114_v20 = vld [vmem:[#allocation3 + $0x260] sm:$0xff]  ;;  %v510_v47 = vadd.f32 %v1937_v62, %v418_v36  ;;  %v119_v62 = vld [vmem:[#allocation3 + $0x288] sm:$0xff]  ;;  %v121_v36 = vld [vmem:[#allocation3 + $0x298] sm:$0xff] }
 0x10c   :  { %v2027_v1 = vpop.f32.mrf.mxu0 }
 0x10d   :  { %v602_v58 = vadd.f32 %v1939_v2, %v510_v47  ;;  %v120_v2 = vld [vmem:[#allocation3 + $0x290] sm:$0xff] }
 0x10f   :  { %v2029_v16 = vpop.f32.mrf.mxu1  ;;  %799 = vmatmul.f32.gmra.mxu0 %v98_v12  ;;  %734 = vmatmul.f32.gmra.mxu3 %v160_v15  ;;  %v113_v15 = vld [vmem:[#allocation3 + $0x258] sm:$0xff] }
 0x110   :  { %1306 = vmatmul.msk.f32.gmra.mxu2 %vm315_vm0, %v100_v27  ;;  %v421_v27 = vadd.f32 %v1946_v9, %v1941_v3 }
 0x112   :  { %891 = vmatmul.f32.gmra.mxu1 %v99_v18  ;;  %v2034_v21 = vpop.f32.mrf.mxu3 }
 0x113   :  { %v2032_v34 = vpop.f32.mrf.mxu2 }
 0x114   :  { %v2036_v26 = vpop.f32.mrf.mxu0 }
 0x117   :  { %v2038_v39 = vpop.f32.mrf.mxu1  ;;  %802 = vmatmul.f32.gmra.mxu0 %v105_v30  ;;  %737 = vmatmul.f32.gmra.mxu3 %v167_v31 }
 0x118   :  { %1307 = vmatmul.msk.f32.gmra.mxu2 %vm315_vm0, %v107_v32 }
 0x11a   :  { %894 = vmatmul.f32.gmra.mxu1 %v106_v40  ;;  %v2045_v52 = vpop.f32.mrf.mxu3  ;;  %v181_v40 = vld [vmem:[#allocation3 + $0x478] sm:$0xff] }
 0x11b   :  { %v2043_v51 = vpop.f32.mrf.mxu2 }
 0x11c   :  { %v2047_v53 = vpop.f32.mrf.mxu0 }
 0x11f   :  { %v2050_v12 = vpop.f32.mrf.mxu1  ;;  %805 = vmatmul.f32.gmra.mxu0 %v112_v56  ;;  %740 = vmatmul.f32.gmra.mxu3 %v174_v0  ;;  %v513_v56 = vadd.f32 %v1948_v11, %v421_v27  ;;  %v126_v11 = vld [vmem:[#allocation3 + $0x2c0] sm:$0xff]  ;;  %v188_v27 = vld [vmem:[#allocation3 + $0x4b0] sm:$0xff] }
 0x120   :  { %1308 = vmatmul.msk.f32.gmra.mxu2 %vm315_vm0, %v114_v20  ;;  %v424_v20 = vadd.f32 %v1946_v9, %v1954_v13 }
 0x121   :  { %v605_v3 = vadd.f32 %v1952_v7, %v513_v56  ;;  %v127_v7 = vld [vmem:[#allocation3 + $0x2c8] sm:$0xff] }
 0x122   :  { %897 = vmatmul.f32.gmra.mxu1 %v113_v15  ;;  %v693_v30 = vpop.f32.mrf.mxu3 }
 0x123   :  { %v2056_v18 = vpop.f32.mrf.mxu2  ;;  %v2058_v31 = vadd.f32 %v693_v30, %v602_v58 }
 0x124   :  { %v2060_v32 = vpop.f32.mrf.mxu0 }
 0x127   :  { %v2063_v0 = vpop.f32.mrf.mxu1  ;;  %808 = vmatmul.f32.gmra.mxu0 %v119_v62  ;;  %743 = vmatmul.f32.gmra.mxu3 %v181_v40  ;;  %v128_v62 = vld [vmem:[#allocation3 + $0x2d0] sm:$0xff]  ;;  %v516_v40 = vadd.f32 %v1956_v17, %v424_v20  ;;  %v133_v17 = vld [vmem:[#allocation3 + $0x2f8] sm:$0xff]  ;;  %v195_v20 = vld [vmem:[#allocation3 + $0x4e8] sm:$0xff] }
 0x128   :  { %1309 = vmatmul.msk.f32.gmra.mxu2 %vm315_vm0, %v121_v36  ;;  %v427_v36 = vadd.f32 %v1946_v9, %v1962_v24 }
 0x129   :  { %v608_v13 = vadd.f32 %v1960_v22, %v516_v40  ;;  %v134_v22 = vld [vmem:[#allocation3 + $0x300] sm:$0xff] }
 0x12a   :  { %900 = vmatmul.f32.gmra.mxu1 %v120_v2  ;;  %v696_v15 = vpop.f32.mrf.mxu3 }
 0x12b   :  { %v2069_v47 = vpop.f32.mrf.mxu2  ;;  %v2071_v58 = vadd.f32 %v696_v15, %v605_v3 }
 0x12c   :  { %v2073_v30 = vpop.f32.mrf.mxu0 }
 0x12f   :  { %v2076_v61 = vpop.f32.mrf.mxu1  ;;  %811 = vmatmul.f32.gmra.mxu0 %v126_v11  ;;  %746 = vmatmul.f32.gmra.mxu3 %v188_v27  ;;  %v135_v11 = vld [vmem:[#allocation3 + $0x308] sm:$0xff]  ;;  %v519_v27 = vadd.f32 %v1964_v29, %v427_v36  ;;  %v140_v29 = vld [vmem:[#allocation3 + $0x330] sm:$0xff]  ;;  %v202_v36 = vld [vmem:[#allocation3 + $0x520] sm:$0xff] }
 0x130   :  { %1310 = vmatmul.msk.f32.gmra.mxu2 %vm315_vm0, %v128_v62  ;;  %v430_v62 = vadd.f32 %v1946_v9, %v1970_v37 }
 0x131   :  { %v611_v24 = vadd.f32 %v1968_v33, %v519_v27  ;;  %v141_v33 = vld [vmem:[#allocation3 + $0x338] sm:$0xff] }
 0x132   :  { %903 = vmatmul.f32.gmra.mxu1 %v127_v7  ;;  %v699_v2 = vpop.f32.mrf.mxu3 }
 0x133   :  { %v2082_v56 = vpop.f32.mrf.mxu2  ;;  %v2084_v3 = vadd.f32 %v699_v2, %v608_v13 }
 0x134   :  { %v2086_v15 = vpop.f32.mrf.mxu0 }
 0x137   :  { %v2089_v14 = vpop.f32.mrf.mxu1  ;;  %814 = vmatmul.f32.gmra.mxu0 %v133_v17  ;;  %749 = vmatmul.f32.gmra.mxu3 %v195_v20  ;;  %v142_v17 = vld [vmem:[#allocation3 + $0x340] sm:$0xff]  ;;  %v522_v20 = vadd.f32 %v1972_v41, %v430_v62  ;;  %v147_v41 = vld [vmem:[#allocation3 + $0x368] sm:$0xff]  ;;  %v209_v62 = vld [vmem:[#allocation3 + $0x558] sm:$0xff] }
 0x138   :  { %1311 = vmatmul.msk.f32.gmra.mxu2 %vm315_vm0, %v135_v11  ;;  %v433_v11 = vadd.f32 %v1946_v9, %v1978_v48  ;;  %v412_v48 = vadd.f32 %v1946_v9, %v1902_v35 }
 0x139   :  { %v614_v37 = vadd.f32 %v1976_v46, %v522_v20  ;;  %v148_v46 = vld [vmem:[#allocation3 + $0x370] sm:$0xff]  ;;  %v436_v20 = vadd.f32 %v1946_v9, %v1987_v63 }
 0x13a   :  { %906 = vmatmul.f32.gmra.mxu1 %v134_v22  ;;  %v702_v7 = vpop.f32.mrf.mxu3 }
 0x13b   :  { %v2095_v40 = vpop.f32.mrf.mxu2  ;;  %v2097_v13 = vadd.f32 %v702_v7, %v611_v24 }
 0x13c   :  { %v2099_v2 = vpop.f32.mrf.mxu0 }
 0x13d   :  { %2400 = vst [vmem:[#allocation12_spill] sm:$0xff] %v2099_v2 }
 0x13f   :  { %v2102_v44 = vpop.f32.mrf.mxu1  ;;  %817 = vmatmul.f32.gmra.mxu0 %v140_v29  ;;  %752 = vmatmul.f32.gmra.mxu3 %v202_v36  ;;  %v149_v29 = vld [vmem:[#allocation3 + $0x378] sm:$0xff]  ;;  %v525_v36 = vadd.f32 %v1980_v55, %v433_v11 }
 0x140   :  { %2401 = vst [vmem:[#allocation13_spill] sm:$0xff] %v2102_v44  ;;  %1312 = vmatmul.msk.f32.gmra.mxu2 %vm315_vm0, %v142_v17 }
 0x141   :  { %v617_v17 = vadd.f32 %v1983_v59, %v525_v36  ;;  %v155_v59 = vld [vmem:[#allocation3 + $0x3a8] sm:$0xff]  ;;  %v415_v36 = vadd.f32 %v1946_v9, %v1929_v50  ;;  %v162_v50 = vld [vmem:[#allocation3 + $0x3e0] sm:$0xff] }
 0x142   :  { %909 = vmatmul.f32.gmra.mxu1 %v141_v33  ;;  %v705_v22 = vpop.f32.mrf.mxu3 }
 0x143   :  { %v2108_v27 = vpop.f32.mrf.mxu2  ;;  %v2110_v24 = vadd.f32 %v705_v22, %v614_v37  ;;  %v154_v22 = vld [vmem:[#allocation3 + $0x3a0] sm:$0xff] }
 0x144   :  { %2402 = vst [vmem:[#allocation14_spill] sm:$0xff] %v2108_v27  ;;  %v2112_v7 = vpop.f32.mrf.mxu0 }
 0x147   :  { %v2115_v44 = vpop.f32.mrf.mxu1  ;;  %820 = vmatmul.f32.gmra.mxu0 %v147_v41  ;;  %755 = vmatmul.f32.gmra.mxu3 %v209_v62  ;;  %v504_v41 = vadd.f32 %v1916_v43, %v412_v48  ;;  %v156_v62 = vld [vmem:[#allocation3 + $0x3b0] sm:$0xff] }
 0x148   :  { %2403 = vst [vmem:[#allocation15_spill] sm:$0xff] %v2115_v44  ;;  %1313 = vmatmul.msk.f32.gmra.mxu2 %vm315_vm0, %v149_v29  ;;  %v528_v29 = vadd.f32 %v1989_v8, %v436_v20 }
 0x149   :  { %v596_v63 = vadd.f32 %v1927_v49, %v504_v41  ;;  %v163_v41 = vld [vmem:[#allocation3 + $0x3e8] sm:$0xff] }
 0x14a   :  { %912 = vmatmul.f32.gmra.mxu1 %v148_v46  ;;  %v708_v37 = vpop.f32.mrf.mxu3  ;;  %v620_v46 = vadd.f32 %v1992_v4, %v528_v29 }
 0x14b   :  { %v2123_v33 = vpop.f32.mrf.mxu2  ;;  %v2125_v55 = vadd.f32 %v708_v37, %v617_v17  ;;  %v688_v43 = vadd.f32 %v2034_v21, %v596_v63 }
 0x14c   :  { %2404 = vst [vmem:[#allocation16_spill] sm:$0xff] %v2123_v33  ;;  %v776_v11 = vpop.f32.mrf.mxu0 }
 0x14d   :  { %v777_v35 = vadd.f32 %v776_v11, %v2025_v6  ;;  %v161_v11 = vld [vmem:[#allocation3 + $0x3d8] sm:$0xff] }
 0x14f   :  { %v868_v27 = vpop.f32.mrf.mxu1  ;;  %823 = vmatmul.f32.gmra.mxu0 %v154_v22  ;;  %v507_v22 = vadd.f32 %v1931_v54, %v415_v36  ;;  %v168_v54 = vld [vmem:[#allocation3 + $0x410] sm:$0xff] }
 0x150   :  { %1314 = vmatmul.msk.f32.gmra.mxu2 %vm315_vm0, %v156_v62  ;;  %v869_v17 = vadd.f32 %v868_v27, %v777_v35 }
 0x151   :  { %v599_v21 = vadd.f32 %v1933_v57, %v507_v22 }
 0x152   :  { %915 = vmatmul.f32.gmra.mxu1 %v155_v59  ;;  %v711_v48 = vpop.f32.mrf.mxu3 }
 0x153   :  { %v960_v8 = vpop.f32.mrf.mxu2  ;;  %v2136_v20 = vadd.f32 %v711_v48, %v620_v46  ;;  %v691_v27 = vadd.f32 %v2045_v52, %v599_v21  ;;  %v170_v46 = vld [vmem:[#allocation3 + $0x420] sm:$0xff] }
 0x154   :  { %v2138_v6 = vadd.f32 %v960_v8, %v869_v17  ;;  %v779_v37 = vpop.f32.mrf.mxu0 }
 0x155   :  { %v780_v49 = vadd.f32 %v779_v37, %v688_v43  ;;  %v169_v43 = vld [vmem:[#allocation3 + $0x418] sm:$0xff] }
 0x157   :  { %v871_v62 = vpop.f32.mrf.mxu1  ;;  %826 = vmatmul.f32.gmra.mxu0 %v161_v11  ;;  %v175_v11 = vld [vmem:[#allocation3 + $0x448] sm:$0xff] }
 0x158   :  { %v872_v4 = vadd.f32 %v871_v62, %v780_v49  ;;  %1315 = vmatmul.msk.f32.gmra.mxu2 %vm315_vm0, %v163_v41  ;;  %v177_v49 = vld [vmem:[#allocation3 + $0x458] sm:$0xff]  ;;  %v176_v62 = vld [vmem:[#allocation3 + $0x450] sm:$0xff] }
 0x15a   :  { %918 = vmatmul.f32.gmra.mxu1 %v162_v50  ;;  %v2144_v29 = vpop.f32.mrf.mxu3 }
 0x15b   :  { %v963_v35 = vpop.f32.mrf.mxu2 }
 0x15c   :  { %v2146_v59 = vadd.f32 %v963_v35, %v872_v4  ;;  %v782_v63 = vpop.f32.mrf.mxu0 }
 0x15d   :  { %v783_v36 = vadd.f32 %v782_v63, %v691_v27  ;;  %v182_v63 = vld [vmem:[#allocation3 + $0x480] sm:$0xff] }
 0x15f   :  { %v874_v17 = vpop.f32.mrf.mxu1  ;;  %829 = vmatmul.f32.gmra.mxu0 %v168_v54 }
 0x160   :  { %v875_v48 = vadd.f32 %v874_v17, %v783_v36  ;;  %1316 = vmatmul.msk.f32.gmra.mxu2 %vm315_vm0, %v170_v46  ;;  %v184_v36 = vld [vmem:[#allocation3 + $0x490] sm:$0xff] }
 0x162   :  { %921 = vmatmul.f32.gmra.mxu1 %v169_v43  ;;  %v2149_v57 = vpop.f32.mrf.mxu3 }
 0x163   :  { %v966_v8 = vpop.f32.mrf.mxu2 }
 0x164   :  { %v2151_v52 = vadd.f32 %v966_v8, %v875_v48  ;;  %v785_v37 = vpop.f32.mrf.mxu0 }
 0x165   :  { %v786_v22 = vadd.f32 %v785_v37, %v2058_v31  ;;  %v183_v31 = vld [vmem:[#allocation3 + $0x488] sm:$0xff] }
 0x166   :  { %vm1037_vm15 = vcmp.gt.f32.partialorder %v2151_v52, 0.0 }
 0x167   :  { %v877_v41 = vpop.f32.mrf.mxu1  ;;  %832 = vmatmul.f32.gmra.mxu0 %v175_v11  ;;  %v189_v11 = vld [vmem:[#allocation3 + $0x4b8] sm:$0xff] }
 0x168   :  { %v878_v50 = vadd.f32 %v877_v41, %v786_v22  ;;  %1317 = vmatmul.msk.f32.gmra.mxu2 %vm315_vm0, %v177_v49  ;;  %v191_v49 = vld [vmem:[#allocation3 + $0x4c8] sm:$0xff] }
 0x16a   :  { %924 = vmatmul.f32.gmra.mxu1 %v176_v62  ;;  %v2155_v4 = vpop.f32.mrf.mxu3 }
 0x16b   :  { %v969_v21 = vpop.f32.mrf.mxu2 }
 0x16c   :  { %v2157_v27 = vadd.f32 %v969_v21, %v878_v50  ;;  %v788_v35 = vpop.f32.mrf.mxu0 }
 0x16d   :  { %v789_v54 = vadd.f32 %v788_v35, %v2071_v58  ;;  %v190_v58 = vld [vmem:[#allocation3 + $0x4c0] sm:$0xff] }
 0x16e   :  { %vm1038_vm14 = vcmp.gt.f32.partialorder %v2157_v27, 0.0 }
 0x16f   :  { %v880_v46 = vpop.f32.mrf.mxu1  ;;  %835 = vmatmul.f32.gmra.mxu0 %v182_v63 }
 0x170   :  { %v881_v17 = vadd.f32 %v880_v46, %v789_v54  ;;  %1318 = vmatmul.msk.f32.gmra.mxu2 %vm315_vm0, %v184_v36  ;;  %v196_v54 = vld [vmem:[#allocation3 + $0x4f0] sm:$0xff]  ;;  %v198_v46 = vld [vmem:[#allocation3 + $0x500] sm:$0xff] }
 0x172   :  { %927 = vmatmul.f32.gmra.mxu1 %v183_v31  ;;  %v2161_v43 = vpop.f32.mrf.mxu3 }
 0x173   :  { %v972_v48 = vpop.f32.mrf.mxu2 }
 0x174   :  { %v2163_v8 = vadd.f32 %v972_v48, %v881_v17  ;;  %v791_v37 = vpop.f32.mrf.mxu0  ;;  %v457_v48 = vadd.f32 %v1946_v9, %v2060_v32 }
 0x175   :  { %v792_v22 = vadd.f32 %v791_v37, %v2084_v3  ;;  %v197_v3 = vld [vmem:[#allocation3 + $0x4f8] sm:$0xff] }
 0x176   :  { %vm1039_vm13 = vcmp.gt.f32.partialorder %v2163_v8, 0.0 }
 0x177   :  { %v883_v41 = vpop.f32.mrf.mxu1  ;;  %838 = vmatmul.f32.gmra.mxu0 %v189_v11 }
 0x178   :  { %v884_v62 = vadd.f32 %v883_v41, %v792_v22  ;;  %1319 = vmatmul.msk.f32.gmra.mxu2 %vm315_vm0, %v191_v49  ;;  %v203_v41 = vld [vmem:[#allocation3 + $0x528] sm:$0xff] }
 0x17a   :  { %930 = vmatmul.f32.gmra.mxu1 %v190_v58  ;;  %v2167_v50 = vpop.f32.mrf.mxu3  ;;  %v205_v58 = vld [vmem:[#allocation3 + $0x538] sm:$0xff] }
 0x17b   :  { %v975_v21 = vpop.f32.mrf.mxu2 }
 0x17c   :  { %v2169_v35 = vadd.f32 %v975_v21, %v884_v62  ;;  %v794_v63 = vpop.f32.mrf.mxu0  ;;  %v549_v62 = vadd.f32 %v2063_v0, %v457_v48  ;;  %v210_v0 = vld [vmem:[#allocation3 + $0x560] sm:$0xff] }
 0x17d   :  { %v795_v36 = vadd.f32 %v794_v63, %v2097_v13  ;;  %v204_v63 = vld [vmem:[#allocation3 + $0x530] sm:$0xff] }
 0x17e   :  { %v641_v32 = vadd.f32 %v2069_v47, %v549_v62  ;;  %v211_v47 = vld [vmem:[#allocation3 + $0x568] sm:$0xff]  ;;  %vm1040_vm12 = vcmp.gt.f32.partialorder %v2169_v35, 0.0 }
 0x17f   :  { %v886_v31 = vpop.f32.mrf.mxu1  ;;  %841 = vmatmul.f32.gmra.mxu0 %v196_v54 }
 0x180   :  { %v887_v17 = vadd.f32 %v886_v31, %v795_v36  ;;  %1320 = vmatmul.msk.f32.gmra.mxu2 %vm315_vm0, %v198_v46  ;;  %v460_v36 = vadd.f32 %v1946_v9, %v2073_v30 }
 0x182   :  { %933 = vmatmul.f32.gmra.mxu1 %v197_v3  ;;  %v2175_v37 = vpop.f32.mrf.mxu3 }
 0x183   :  { %v978_v11 = vpop.f32.mrf.mxu2 }
 0x184   :  { %v2177_v22 = vadd.f32 %v978_v11, %v887_v17  ;;  %v797_v49 = vpop.f32.mrf.mxu0  ;;  %v212_v11 = vld [vmem:[#allocation3 + $0x570] sm:$0xff] }
 0x185   :  { %v798_v13 = vadd.f32 %v797_v49, %v2110_v24  ;;  %v552_v49 = vadd.f32 %v2076_v61, %v460_v36 }
 0x186   :  { %vm1041_vm11 = vcmp.gt.f32.partialorder %v2177_v22, 0.0 }
 0x187   :  { %v889_v21 = vpop.f32.mrf.mxu1  ;;  %844 = vmatmul.f32.gmra.mxu0 %v203_v41  ;;  %v644_v30 = vadd.f32 %v2082_v56, %v552_v49 }
 0x188   :  { %v890_v54 = vadd.f32 %v889_v21, %v798_v13  ;;  %1321 = vmatmul.msk.f32.gmra.mxu2 %vm315_vm0, %v205_v58  ;;  %v463_v58 = vadd.f32 %v1946_v9, %v2086_v15 }
 0x18a   :  { %936 = vmatmul.f32.gmra.mxu1 %v204_v63  ;;  %v732_v46 = vpop.f32.mrf.mxu3 }
 0x18b   :  { %v981_v31 = vpop.f32.mrf.mxu2  ;;  %v2185_v3 = vadd.f32 %v732_v46, %v641_v32  ;;  %v555_v32 = vadd.f32 %v2089_v14, %v463_v58 }
 0x18c   :  { %v2187_v24 = vadd.f32 %v981_v31, %v890_v54  ;;  %v800_v17 = vpop.f32.mrf.mxu0 }
 0x18d   :  { %v801_v48 = vadd.f32 %v800_v17, %v2125_v55  ;;  %v647_v31 = vadd.f32 %v2095_v40, %v555_v32  ;;  %v448_v32 = vadd.f32 %v1946_v9, %v2027_v1 }
 0x18e   :  { %vm1042_vm10 = vcmp.gt.f32.partialorder %v2187_v24, 0.0 }
 0x18f   :  { %v892_v41 = vpop.f32.mrf.mxu1  ;;  %847 = vmatmul.f32.gmra.mxu0 %v210_v0 }
 0x190   :  { %v893_v13 = vadd.f32 %v892_v41, %v801_v48  ;;  %1322 = vmatmul.msk.f32.gmra.mxu2 %vm315_vm0, %v212_v11  ;;  %vm1036_vm0 = vcmp.gt.f32.partialorder %v2146_v59, 0.0 }
 0x192   :  { %939 = vmatmul.f32.gmra.mxu1 %v211_v47  ;;  %v735_v62 = vpop.f32.mrf.mxu3 }
 0x193   :  { %v984_v21 = vpop.f32.mrf.mxu2  ;;  %v2195_v63 = vadd.f32 %v735_v62, %v644_v30  ;;  %v451_v62 = vadd.f32 %v1946_v9, %v2036_v26 }
 0x194   :  { %v2197_v55 = vadd.f32 %v984_v21, %v893_v13  ;;  %v803_v54 = vpop.f32.mrf.mxu0  ;;  %v454_v21 = vadd.f32 %v1946_v9, %v2047_v53 }
 0x195   :  { %v804_v61 = vadd.f32 %v803_v54, %v2136_v20 }
 0x196   :  { %vm1043_vm9 = vcmp.gt.f32.partialorder %v2197_v55, 0.0 }
 0x197   :  { %v895_v36 = vpop.f32.mrf.mxu1 }
 0x198   :  { %v896_v46 = vadd.f32 %v895_v36, %v804_v61  ;;  %v543_v36 = vadd.f32 %v2038_v39, %v451_v62  ;;  %v442_v39 = vadd.f32 %v1946_v9, %v2005_v23 }
 0x19a   :  { %v738_v56 = vpop.f32.mrf.mxu3  ;;  %v635_v26 = vadd.f32 %v2043_v51, %v543_v36 }
 0x19b   :  { %v987_v17 = vpop.f32.mrf.mxu2  ;;  %v2202_v0 = vadd.f32 %v738_v56, %v647_v31  ;;  %v445_v56 = vadd.f32 %v1946_v9, %v2016_v45 }
 0x19c   :  { %v2204_v15 = vadd.f32 %v987_v17, %v896_v46  ;;  %v2206_v48 = vpop.f32.mrf.mxu0  ;;  %v546_v46 = vadd.f32 %v2050_v12, %v454_v21  ;;  %v540_v17 = vadd.f32 %v2029_v16, %v448_v32  ;;  %v727_v44 = vadd.f32 %v2167_v50, %v635_v26 }
 0x19d   :  { %v537_v12 = vadd.f32 %v2019_v60, %v445_v56  ;;  %v534_v50 = vadd.f32 %v2007_v38, %v442_v39 }
 0x19e   :  { %v638_v33 = vadd.f32 %v2056_v18, %v546_v46  ;;  %v632_v62 = vadd.f32 %v2032_v34, %v540_v17  ;;  %v439_v18 = vadd.f32 %v1946_v9, %v1996_v10  ;;  %vm1044_vm8 = vcmp.gt.f32.partialorder %v2204_v15, 0.0 }
 0x19f   :  { %v2208_v11 = vpop.f32.mrf.mxu1 }
 0x1a0   :  { %v730_v2 = vadd.f32 %v2175_v37, %v638_v33  ;;  %v724_v51 = vadd.f32 %v2161_v43, %v632_v62  ;;  %v629_v33 = vadd.f32 %v2023_v5, %v537_v12  ;;  %v626_v43 = vadd.f32 %v2012_v42, %v534_v50 }
 0x1a2   :  { %v721_v23 = vadd.f32 %v2155_v4, %v629_v33  ;;  %v718_v5 = vadd.f32 %v2149_v57, %v626_v43 }
 0x1a3   :  { %v2210_v49 = vpop.f32.mrf.mxu2 }
 0x1a4   :  { %v809_v41 = vpop.f32.mrf.mxu0 }
 0x1a7   :  { %v2212_v20 = vpop.f32.mrf.mxu1 }
 0x1ab   :  { %v2214_v14 = vpop.f32.mrf.mxu2 }
 0x1ac   :  { %v812_v47 = vpop.f32.mrf.mxu0 }
 0x1af   :  { %v904_v13 = vpop.f32.mrf.mxu1 }
 0x1b3   :  { %v996_v40 = vpop.f32.mrf.mxu2 }
 0x1b4   :  { %v815_v30 = vpop.f32.mrf.mxu0 }
 0x1b5   :  { %v816_v37 = vadd.f32 %v815_v30, %v724_v51 }
 0x1b7   :  { %v907_v58 = vpop.f32.mrf.mxu1 }
 0x1b8   :  { %v908_v10 = vadd.f32 %v907_v58, %v816_v37 }
 0x1bb   :  { %v999_v54 = vpop.f32.mrf.mxu2 }
 0x1bc   :  { %v818_v61 = vpop.f32.mrf.mxu0 }
 0x1bd   :  { %v819_v45 = vadd.f32 %v818_v61, %v727_v44  ;;  %v813_v61 = vadd.f32 %v812_v47, %v721_v23 }
 0x1bf   :  { %v910_v31 = vpop.f32.mrf.mxu1  ;;  %v905_v42 = vadd.f32 %v904_v13, %v813_v61  ;;  %v1067_v61 = vmul.f32 0.01, %v2187_v24 }
 0x1c0   :  { %v911_v32 = vadd.f32 %v910_v31, %v819_v45  ;;  %v1000_v31 = vadd.f32 %v999_v54, %v908_v10 }
 0x1c1   :  { %v997_v58 = vadd.f32 %v996_v40, %v905_v42  ;;  %v1063_v42 = vmul.f32 0.01, %v2157_v27 }
 0x1c2   :  { %vm1048_vm4 = vcmp.gt.f32.partialorder %v1000_v31, 0.0 }
 0x1c3   :  { %v1002_v53 = vpop.f32.mrf.mxu2  ;;  %v1072_v40 = vmul.f32 0.01, %v997_v58  ;;  %vm1047_vm5 = vcmp.gt.f32.partialorder %v997_v58, 0.0 }
 0x1c4   :  { %v821_v1 = vpop.f32.mrf.mxu0  ;;  %v1003_v46 = vadd.f32 %v1002_v53, %v911_v32  ;;  %v1073_v53 = vmul.f32 0.01, %v1000_v31 }
 0x1c5   :  { %v822_v21 = vadd.f32 %v821_v1, %v730_v2  ;;  %v531_v2 = vadd.f32 %v1998_v19, %v439_v18  ;;  %v810_v19 = vadd.f32 %v809_v41, %v718_v5  ;;  %v2254_v41 = vpop.f32.mrf.mxu3  ;;  %v1097_v18 = vsel %vm1047_vm5, %v997_v58, %v1072_v40 }
 0x1c6   :  { %v1074_v4 = vmul.f32 0.01, %v1003_v46  ;;  %vm1049_vm3 = vcmp.gt.f32.partialorder %v1003_v46, 0.0  ;;  %v1098_v45 = vsel %vm1048_vm4, %v1000_v31, %v1073_v53  ;;  %v1092_v5 = vsel %vm1042_vm10, %v2187_v24, %v1067_v61 }
 0x1c7   :  { %v913_v16 = vpop.f32.mrf.mxu1  ;;  %v623_v26 = vadd.f32 %v2001_v25, %v531_v2  ;;  %v902_v12 = vadd.f32 %v2212_v20, %v810_v19  ;;  %v1065_v31 = vmul.f32 0.01, %v2169_v35  ;;  %v1064_v24 = vmul.f32 0.01, %v2163_v8 }
 0x1c8   :  { %v914_v36 = vadd.f32 %v913_v16, %v822_v21  ;;  %v1099_v39 = vsel %vm1049_vm3, %v1003_v46, %v1074_v4  ;;  %v1062_v53 = vmul.f32 0.01, %v2151_v52 }
 0x1cb   :  { %v1005_v60 = vpop.f32.mrf.mxu2 }
 0x1cc   :  { %v1006_v34 = vadd.f32 %v1005_v60, %v914_v36  ;;  %v824_v44 = vpop.f32.mrf.mxu0 }
 0x1cd   :  { %v825_v9 = vadd.f32 %v824_v44, %v2185_v3  ;;  %v715_v3 = vadd.f32 %v2144_v29, %v623_v26  ;;  %v994_v29 = vadd.f32 %v2214_v14, %v902_v12  ;;  %v2264_v36 = vpop.f32.mrf.mxu3  ;;  %v1090_v26 = vsel %vm1040_vm12, %v2169_v35, %v1065_v31 }
 0x1ce   :  { %vm1050_vm1 = vcmp.gt.f32.partialorder %v1006_v34, 0.0  ;;  %v1075_v38 = vmul.f32 0.01, %v1006_v34  ;;  %v1088_v35 = vsel %vm1038_vm14, %v2157_v27, %v1063_v42  ;;  %v1060_v12 = vmul.f32 0.01, %v2138_v6 }
 0x1cf   :  { %v916_v30 = vpop.f32.mrf.mxu1  ;;  %v807_v25 = vadd.f32 %v2206_v48, %v715_v3  ;;  %v1071_v51 = vmul.f32 0.01, %v994_v29  ;;  %vm1046_vm6 = vcmp.gt.f32.partialorder %v994_v29, 0.0  ;;  %v1089_v3 = vsel %vm1039_vm13, %v2163_v8, %v1064_v24 }
 0x1d0   :  { %v1100_v56 = vsel %vm1050_vm1, %v1006_v34, %v1075_v38  ;;  %v917_v17 = vadd.f32 %v916_v30, %v825_v9  ;;  %v1068_v34 = vmul.f32 0.01, %v2197_v55  ;;  %v1087_v8 = vsel %vm1037_vm15, %v2151_v52, %v1062_v53 }
 0x1d1   :  { %1323 = vmatpush.xpose.msk.msra.mxu3 %vm1113_vm2, %v1100_v56  ;;  %v899_v21 = vadd.f32 %v2208_v11, %v807_v25  ;;  %v1096_v32 = vsel %vm1046_vm6, %v994_v29, %v1071_v51  ;;  %vm1035_vm1 = vcmp.gt.f32.partialorder %v2138_v6, 0.0 }
 0x1d2   :  { %v1093_v10 = vsel %vm1043_vm9, %v2197_v55, %v1068_v34 }
 0x1d3   :  { %v1008_v47 = vpop.f32.mrf.mxu2  ;;  %v991_v16 = vadd.f32 %v2210_v49, %v899_v21  ;;  %v1069_v49 = vmul.f32 0.01, %v2204_v15  ;;  %v1085_v21 = vsel %vm1035_vm1, %v2138_v6, %v1060_v12  ;;  %v2407_v6 = vld [vmem:[#allocation12_spill] sm:$0xff] }
 0x1d4   :  { %v2248_v1 = vadd.f32 %v1008_v47, %v917_v17  ;;  %v827_v57 = vpop.f32.mrf.mxu0 }
 0x1d5   :  { %v828_v54 = vadd.f32 %v827_v57, %v2195_v63  ;;  %1324 = vmatpush.xpose.msk.msra.mxu3 %vm1113_vm2, %v1099_v39  ;;  %v1070_v33 = vmul.f32 0.01, %v991_v16  ;;  %vm1045_vm7 = vcmp.gt.f32.partialorder %v991_v16, 0.0  ;;  %v1094_v44 = vsel %vm1044_vm8, %v2204_v15, %v1069_v49  ;;  %v2280_v2 = vpop.f32.mrf.mxu3 }
 0x1d6   :  { %v1066_v15 = vmul.f32 0.01, %v2177_v22  ;;  %v1061_v39 = vmul.f32 0.01, %v2146_v59 }
 0x1d7   :  { %v919_v13 = vpop.f32.mrf.mxu1  ;;  %v1095_v46 = vsel %vm1045_vm7, %v991_v16, %v1070_v33  ;;  %v2408_v33 = vld [vmem:[#allocation15_spill] sm:$0xff] }
 0x1d8   :  { %v920_v62 = vadd.f32 %v919_v13, %v828_v54  ;;  %v1091_v55 = vsel %vm1041_vm11, %v2177_v22, %v1066_v15  ;;  %v1086_v13 = vsel %vm1036_vm0, %v2146_v59, %v1061_v39  ;;  %v2337_v59 = vld [vmem:[%s2394_s3] sm:$0x1]  ;;  %vm1051_vm11 = vcmp.gt.f32.partialorder %v2248_v1, 0.0 }
 0x1d9   :  { %1325 = vmatpush.xpose.msk.msra.mxu3 %vm1113_vm2, %v1098_v45 }
 0x1db   :  { %v1011_v63 = vpop.f32.mrf.mxu2 }
 0x1dc   :  { %v2260_v48 = vadd.f32 %v1011_v63, %v920_v62  ;;  %v830_v20 = vpop.f32.mrf.mxu0  ;;  %v2405_v62 = vld [vmem:[#allocation11_spill] sm:$0xff]  ;;  %v1411_v63 = vld [vmem:[%s2393_s2] ss:$0 sm:$0xff] }
 0x1dd   :  { %v831_v50 = vadd.f32 %v830_v20, %v2202_v0  ;;  %1326 = vmatpush.xpose.msk.msra.mxu3 %vm1113_vm2, %v1097_v18  ;;  %v750_v56 = vpop.f32.mrf.mxu3  ;;  %v469_v16 = vadd.f32 %v1411_v63, %v2112_v7  ;;  %v2406_v18 = vld [vmem:[#allocation10_spill] sm:$0xff] }
 0x1de   :  { %vm1052_vm10 = vcmp.gt.f32.partialorder %v2260_v48, 0.0 }
 0x1df   :  { %v922_v14 = vpop.f32.mrf.mxu1 }
 0x1e0   :  { %v923_v37 = vadd.f32 %v922_v14, %v831_v50  ;;  %v751_v50 = vadd.f32 %v750_v56, %v2406_v18  ;;  %v466_v14 = vadd.f32 %v1411_v63, %v2407_v6 }
 0x1e1   :  { %1327 = vmatpush.xpose.msk.msra.mxu3 %vm1113_vm2, %v1096_v32 }
 0x1e3   :  { %v1014_v11 = vpop.f32.mrf.mxu2 }
 0x1e4   :  { %v2268_v23 = vadd.f32 %v1014_v11, %v923_v37  ;;  %v2270_v60 = vpop.f32.mrf.mxu0  ;;  %v561_v37 = vadd.f32 %v2408_v33, %v469_v16 }
 0x1e5   :  { %1328 = vmatpush.xpose.msk.msra.mxu3 %vm1113_vm2, %v1095_v46  ;;  %v753_v47 = vpop.f32.mrf.mxu3  ;;  %v2409_v46 = vld [vmem:[#allocation9_spill] sm:$0xff] }
 0x1e6   :  { %v754_v40 = vadd.f32 %v753_v47, %v2003_v28  ;;  %v748_v34 = vadd.f32 %v2280_v2, %v2409_v46  ;;  %v2412_v47 = vld [vmem:[#allocation14_spill] sm:$0xff]  ;;  %vm1053_vm9 = vcmp.gt.f32.partialorder %v2268_v23, 0.0 }
 0x1e7   :  { %v2274_v0 = vpop.f32.mrf.mxu1 }
 0x1e9   :  { %1329 = vmatpush.xpose.msk.msra.mxu3 %vm1113_vm2, %v1094_v44 }
 0x1eb   :  { %v2282_v43 = vpop.f32.mrf.mxu2 }
 0x1ec   :  { %v2285_v9 = vpop.f32.mrf.mxu0 }
 0x1ed   :  { %1330 = vmatpush.xpose.msk.msra.mxu3 %vm1113_vm2, %v1093_v10  ;;  %v756_v27 = vpop.f32.mrf.mxu3  ;;  %v2410_v10 = vld [vmem:[#allocation13_spill] sm:$0xff] }
 0x1ee   :  { %v757_v45 = vadd.f32 %v756_v27, %v2405_v62  ;;  %v558_v15 = vadd.f32 %v2410_v10, %v466_v14  ;;  %v1076_v27 = vmul.f32 0.01, %v2248_v1 }
 0x1ef   :  { %v2290_v38 = vpop.f32.mrf.mxu1 }
 0x1f0   :  { %v650_v2 = vadd.f32 %v2412_v47, %v558_v15  ;;  %v1276_v15 = vlaneseq }
 0x1f1   :  { %1331 = vmatpush.xpose.msk.msra.mxu3 %vm1113_vm2, %v1092_v5  ;;  %v2411_v5 = vld [vmem:[#allocation16_spill] sm:$0xff] }
 0x1f2   :  { %v653_v31 = vadd.f32 %v2411_v5, %v561_v37  ;;  %v742_v39 = vadd.f32 %v2254_v41, %v650_v2 }
 0x1f3   :  { %v2296_v30 = vpop.f32.mrf.mxu2 }
 0x1f4   :  { %v839_v4 = vpop.f32.mrf.mxu0 }
 0x1f5   :  { %1332 = vmatpush.xpose.msk.msra.mxu3 %vm1113_vm2, %v1091_v55  ;;  %v840_v55 = vadd.f32 %v839_v4, %v748_v34 }
 0x1f7   :  { %v2302_v17 = vpop.f32.mrf.mxu1 }
 0x1f9   :  { %1333 = vmatpush.xpose.msk.msra.mxu3 %vm1113_vm2, %v1090_v26  ;;  %v745_v26 = vadd.f32 %v2264_v36, %v653_v31  ;;  %v834_v36 = vadd.f32 %v2270_v60, %v742_v39 }
 0x1fb   :  { %v2308_v19 = vpop.f32.mrf.mxu2  ;;  %v837_v53 = vadd.f32 %v2285_v9, %v745_v26  ;;  %v926_v41 = vadd.f32 %v2274_v0, %v834_v36  ;;  %v1077_v0 = vmul.f32 0.01, %v2260_v48 }
 0x1fc   :  { %v842_v22 = vpop.f32.mrf.mxu0 }
 0x1fd   :  { %1334 = vmatpush.xpose.msk.msra.mxu3 %vm1113_vm2, %v1089_v3  ;;  %v843_v7 = vadd.f32 %v842_v22, %v751_v50  ;;  %v1018_v9 = vadd.f32 %v2282_v43, %v926_v41 }
 0x1ff   :  { %v934_v58 = vpop.f32.mrf.mxu1  ;;  %vm1054_vm8 = vcmp.gt.f32.partialorder %v1018_v9, 0.0 }
 0x200   :  { %v935_v56 = vadd.f32 %v934_v58, %v843_v7 }
 0x201   :  { %1335 = vmatpush.xpose.msk.msra.mxu3 %vm1113_vm2, %v1088_v35  ;;  %v932_v35 = vadd.f32 %v2302_v17, %v840_v55 }
 0x203   :  { %v1026_v57 = vpop.f32.mrf.mxu2  ;;  %v1024_v4 = vadd.f32 %v2308_v19, %v932_v35 }
 0x204   :  { %v845_v54 = vpop.f32.mrf.mxu0  ;;  %v1027_v42 = vadd.f32 %v1026_v57, %v935_v56  ;;  %v929_v57 = vadd.f32 %v2290_v38, %v837_v53  ;;  %v1078_v38 = vmul.f32 0.01, %v2268_v23 }
 0x205   :  { %1336 = vmatpush.xpose.msk.msra.mxu3 %vm1113_vm2, %v1087_v8  ;;  %v846_v51 = vadd.f32 %v845_v54, %v754_v40  ;;  %vm1056_vm6 = vcmp.gt.f32.partialorder %v1024_v4, 0.0  ;;  %v1101_v40 = vsel %vm1051_vm11, %v2248_v1, %v1076_v27 }
 0x206   :  { %v1082_v58 = vmul.f32 0.01, %v1027_v42  ;;  %vm1057_vm5 = vcmp.gt.f32.partialorder %v1027_v42, 0.0  ;;  %v1021_v8 = vadd.f32 %v2296_v30, %v929_v57  ;;  %v1103_v43 = vsel %vm1053_vm9, %v2268_v23, %v1078_v38 }
 0x207   :  { %v937_v25 = vpop.f32.mrf.mxu1  ;;  %v1112_v23 = vstv %s2395_s4  ;;  %s1467_s4 = smov [#allocation6]  }
 0x208   :  { %v938_v32 = vadd.f32 %v937_v25, %v846_v51  ;;  %v1081_v25 = vmul.f32 0.01, %v1024_v4  ;;  %v1107_v12 = vsel %vm1057_vm5, %v1027_v42, %v1082_v58  ;;  %v1080_v17 = vmul.f32 0.01, %v1021_v8  ;;  %s1286_s18 = sshll.u32 %s1467_s4, 4  ;;  %s1287_s18 = int_to_ptr.vmem [resolvable:$true] %s1286_s18 }
 0x209   :  { %1337 = vmatpush.xpose.msk.msra.mxu3 %vm1113_vm2, %v1086_v13  ;;  %vm1055_vm7 = vcmp.gt.f32.partialorder %v1021_v8, 0.0  ;;  %v1079_v13 = vmul.f32 0.01, %v1018_v9  ;;  %vm1278_vm5 = vcmp.lt.s32.totalorder %v1276_v15, 200 }
 0x20a   :  { %v1106_v19 = vsel %vm1056_vm6, %v1024_v4, %v1081_v25  ;;  %v1105_v60 = vsel %vm1055_vm7, %v1021_v8, %v1080_v17 }
 0x20b   :  { %v1029_v29 = vpop.f32.mrf.mxu2  ;;  %v1104_v30 = vsel %vm1054_vm8, %v1018_v9, %v1079_v13 }
 0x20c   :  { %v848_v52 = vpop.f32.mrf.mxu0  ;;  %v1030_v44 = vadd.f32 %v1029_v29, %v938_v32  ;;  %v1102_v29 = vsel %vm1052_vm10, %v2260_v48, %v1077_v0 }
 0x20d   :  { %1338 = vmatpush.xpose.msk.msra.mxu3 %vm1113_vm2, %v1085_v21  ;;  %v849_v28 = vadd.f32 %v848_v52, %v757_v45 }
 0x20e   :  { %v1083_v22 = vmul.f32 0.01, %v1030_v44  ;;  %vm1058_vm4 = vcmp.gt.f32.partialorder %v1030_v44, 0.0 }
 0x20f   :  { %v940_v20 = vpop.f32.mrf.mxu1 }
 0x210   :  { %1339 = vmatmul.msk.f32.vlgmr.msra.gmra.mxu3 %vm1113_vm2, %v2337_v59  ;;  %v941_v11 = vadd.f32 %v940_v20, %v849_v28  ;;  %v1108_v54 = vsel %vm1058_vm4, %v1030_v44, %v1083_v22  ;;  %vm1273_vm4 = vcmask 1040384  }
 0x213   :  { %v1032_v49 = vpop.f32.mrf.mxu2 }
 0x214   :  { %v1033_v61 = vadd.f32 %v1032_v49, %v941_v11 }
 0x216   :  { %vm1059_vm3 = vcmp.gt.f32.partialorder %v1033_v61, 0.0  ;;  %v1084_v24 = vmul.f32 0.01, %v1033_v61 }
 0x218   :  { %v1109_v3 = vsel %vm1059_vm3, %v1033_v61, %v1084_v24 }
 0x219   :  { %1340 = vmatpush.xpose.msk.msrb.mxu3 %vm1113_vm2, %v1109_v3 }
 0x21d   :  { %1341 = vmatpush.xpose.msk.msrb.mxu3 %vm1113_vm2, %v1108_v54 }
 0x221   :  { %1342 = vmatpush.xpose.msk.msrb.mxu3 %vm1113_vm2, %v1107_v12 }
 0x225   :  { %1343 = vmatpush.xpose.msk.msrb.mxu3 %vm1113_vm2, %v1106_v19 }
 0x229   :  { %1344 = vmatpush.xpose.msk.msrb.mxu3 %vm1113_vm2, %v1105_v60 }
 0x22d   :  { %1345 = vmatpush.xpose.msk.msrb.mxu3 %vm1113_vm2, %v1104_v30 }
 0x231   :  { %1346 = vmatpush.xpose.msk.msrb.mxu3 %vm1113_vm2, %v1103_v43 }
 0x235   :  { %1347 = vmatpush.xpose.msk.msrb.mxu3 %vm1113_vm2, %v1102_v29 }
 0x239   :  { %1348 = vmatpush.xpose.msk.msrb.mxu3 %vm1113_vm2, %v1101_v40 }
 0x23c   :  { %1349 = vmatmul.msk.f32.vlgmr.msrb.gmra.mxu3 %vm1113_vm2, %v2337_v59 }
 0x293   :  { %v1209_v62 = vpop.f32.mrf.mxu3 }
 0x294   :  { %v1210_v45 = vadd.f32 %v1209_v62, %v1112_v23 }
 0x296   :  { %v1232_v52 = vsub.f32 0.0, %v1210_v45 }
 0x298   :  { %v1234_v21 = vmul.f32 1.442695, %v1232_v52 }
 0x29a   :  { %1403 = vpow2.f32 %v1234_v21 }
 0x2a0   :  { %v1404_v48 = vpop.eup %1403 }
 0x2a1   :  { %v1238_v51 = vadd.f32 1.0, %v1404_v48 }
 0x2a3   :  { %1405 = vrcp.f32 %v1238_v51  ;;  %vm1245_vm2 = vweird.f32 %v1238_v51  ;;  %v1249_v32 = vand.u32 2147483647, %v1238_v51  ;;  %v1251_v11 = vand.u32 2147483648, %v1238_v51 }
 0x2a5   :  { %v1252_v5 = vor.u32 1.1754944e-38, %v1251_v11  ;;  %vm1250_vm1 = vcmp.eq.f32.partialorder %v1249_v32, 8.507059e+37 }
 0x2a9   :  { %v1406_v20 = vpop.eup %1405 }
 0x2aa   :  { %v1241_v50 = vmul.f32 %v1406_v20, %v1238_v51  ;;  %vm1246_vm12 = vweird.f32 %v1406_v20 }
 0x2ab   :  { %vm2382_vm14 = vmor %vm1245_vm2, %vm1246_vm12 }
 0x2ac   :  { %v1242_v6 = vsub.f32 1.0, %v1241_v50 }
 0x2ae   :  { %v1243_v37 = vmul.f32 %v1406_v20, %v1242_v6 }
 0x2b0   :  { %v1244_v34 = vadd.f32 %v1406_v20, %v1243_v37 }
 0x2b2   :  { %v1248_v55 = vsel %vm2382_vm14, %v1406_v20, %v1244_v34 }
 0x2b3   :  { %v1253_v42 = vsel %vm1250_vm1, %v1252_v5, %v1248_v55 }
 0x2bf   :  { %v1229_v63 = vpop.f32.mrf.mxu3 }
 0x2c0   :  { %v1230_v16 = vadd.f32 %v1229_v63, %v1112_v23 }
 0x2c2   :  { %v1233_v28 = vsub.f32 0.0, %v1230_v16 }
 0x2c4   :  { %v1236_v1 = vmul.f32 1.442695, %v1233_v28 }
 0x2c6   :  { %1407 = vpow2.f32 %v1236_v1 }
 0x2cc   :  { %v1408_v18 = vpop.eup %1407 }
 0x2cd   :  { %v1239_v59 = vadd.f32 1.0, %v1408_v18 }
 0x2cf   :  { %1409 = vrcp.f32 %v1239_v59  ;;  %v1266_v49 = vand.u32 2147483648, %v1239_v59  ;;  %v1264_v44 = vand.u32 2147483647, %v1239_v59  ;;  %vm1260_vm15 = vweird.f32 %v1239_v59 }
 0x2d1   :  { %v1267_v31 = vor.u32 1.1754944e-38, %v1266_v49  ;;  %vm1265_vm3 = vcmp.eq.f32.partialorder %v1264_v44, 8.507059e+37 }
 0x2d5   :  { %v1410_v14 = vpop.eup %1409 }
 0x2d6   :  { %v1256_v33 = vmul.f32 %v1410_v14, %v1239_v59  ;;  %vm1261_vm13 = vweird.f32 %v1410_v14 }
 0x2d7   :  { %vm1262_vm0 = vmor %vm1260_vm15, %vm1261_vm13 }
 0x2d8   :  { %v1257_v7 = vsub.f32 1.0, %v1256_v33 }
 0x2da   :  { %v1258_v46 = vmul.f32 %v1410_v14, %v1257_v7 }
 0x2dc   :  { %v1259_v10 = vadd.f32 %v1410_v14, %v1258_v46 }
 0x2de   :  { %v1263_v56 = vsel %vm1262_vm0, %v1410_v14, %v1259_v10 }
 0x2df   :  { %v1268_v24 = vsel %vm1265_vm3, %v1267_v31, %v1263_v56 }
 0x2e0   :  { %v1272_v26 = vrot.slane %v1268_v24, 7 }
 0x2e2   :  { %v1274_v22 = vsel %vm1273_vm4, %v1253_v42, %v1272_v26 }
 0x2e3   :  { %1280 = vst.msk [vmem:[#allocation6] sm:$0x3] %vm1278_vm5, %v1274_v22 }
 0x2e4   :  { %1291 = dma.vmem_to_hbm [thread:$0]  %s1287_s18, 32, %s1289_s21, [#allocation5]  }
 0x2e5   :  { %1462 = dma.done.wait [#allocation5], 32  }
 0x2e6   :  { %1463 = vsyncadd [#allocation5], 4294967264 }
 0x2e7   :  { %1296 = vsyncpa [#allocation4], 1 }
 0x2e8   :  { %1297 = vsyncpa [#allocation5], 1 }

</bundles_post_ra>
